<compile_context>
chip_gen: v7x
topology: tpu7x:2x2x1
jax: 0.10.0
libtpu: 0.0.40
codegen_flags: <defaults>
</compile_context>

<pallas_src>
import functools

import numpy as np
import jax
import jax.numpy as jnp
from jax.experimental import pallas as pl
from jax.experimental.pallas import tpu as pltpu

EPS = 1e-5  # PyTorch BatchNorm2d default


# ---------------------------------------------------------------------------
# in-kernel helpers
# ---------------------------------------------------------------------------
def _band_conv(x2d, wb_ref):
    """3x3 'SAME' conv of one (H, W*Cin) bf16 tile -> (H, W*Cout) f32.

    wb_ref holds three (W*Cin, W*Cout) block-Toeplitz band matrices, one per
    kernel row dy; the W taps / W zero padding live inside the bands, the H
    taps are sublane rolls of the f32 matmul results with a zeroed border row.
    """
    H = x2d.shape[0]
    m0 = jnp.dot(x2d, wb_ref[0], preferred_element_type=jnp.float32)
    m1 = jnp.dot(x2d, wb_ref[1], preferred_element_type=jnp.float32)
    m2 = jnp.dot(x2d, wb_ref[2], preferred_element_type=jnp.float32)
    row = jax.lax.broadcasted_iota(jnp.int32, m1.shape, 0)
    # y[h] = x[h-1] @ Wb0 + x[h] @ Wb1 + x[h+1] @ Wb2, rows outside [0,H) = 0.
    down = jnp.where(row == 0, 0.0, pltpu.roll(m0, 1, axis=0))       # m0[h-1]
    up = jnp.where(row == H - 1, 0.0, pltpu.roll(m2, H - 1, axis=0))  # m2[h+1]
    return m1 + down + up


def _channel_stats(acc, cout):
    """Per-channel (sum, sum_sq) of an (H, W*cout) f32 tile -> (2, cout)."""
    wc = acc.shape[-1]
    lane = jax.lax.broadcasted_iota(jnp.int32, (wc, cout), 0)
    chan = jax.lax.broadcasted_iota(jnp.int32, (wc, cout), 1)
    sel = (lane % cout == chan).astype(jnp.float32)        # channel selector
    sums = jnp.concatenate(
        [jnp.sum(acc, axis=0, keepdims=True),
         jnp.sum(acc * acc, axis=0, keepdims=True)], axis=0)          # (2, W*cout)
    return jnp.dot(sums, sel, preferred_element_type=jnp.float32)     # (2, cout)


# ---------------------------------------------------------------------------
# kernels
# ---------------------------------------------------------------------------
def _conv1_kernel(x_ref, wb_ref, out_ref, stats_ref):
    # Stage 1: conv1 + per-tile BN1 partial statistics.
    # (Conv bias omitted: exactly cancelled by training-mode BN mean subtraction.)
    acc = _band_conv(x_ref[0], wb_ref)                       # (H, W*Cmid) f32
    out_ref[...] = acc[None].astype(out_ref.dtype)           # bf16, lane-dense
    stats_ref[...] = _channel_stats(acc, stats_ref.shape[-1])[None]


def _bn_prelu_conv2_kernel(h_ref, sc_ref, sh_ref, a_ref, wb_ref, out_ref, stats_ref):
    # Stage 2: BN1 (batch stats pre-reduced to scale/shift) + PReLU1 in f32,
    # then conv2 + per-tile BN2 partial statistics.
    # sc/sh/a are pre-tiled along W in the wrapper to match the (W*C) lanes.
    h = h_ref[0].astype(jnp.float32) * sc_ref[...] + sh_ref[...]
    h = jnp.where(h >= 0.0, h, a_ref[...] * h)
    acc = _band_conv(h.astype(jnp.bfloat16), wb_ref)         # (H, W*Cout) f32
    out_ref[...] = acc[None].astype(out_ref.dtype)
    stats_ref[...] = _channel_stats(acc, stats_ref.shape[-1])[None]


def _bn_prelu_out_kernel(h_ref, sc_ref, sh_ref, a_ref, out_ref, *, nchw):
    # Stage 3: BN2 + PReLU2 (+ optional in-kernel NHWC->NCHW layout change so
    # the wrapper needs no extra transpose pass over the output).
    y = h_ref[0].astype(jnp.float32) * sc_ref[...] + sh_ref[...]
    y = jnp.where(y >= 0.0, y, a_ref[...] * y)               # (H, W*Cout) f32
    if nchw:
        H, wc = y.shape
        cout = out_ref.shape[1]
        y2 = y.reshape(H * (wc // cout), cout)               # (H*W, Cout)
        eye = (jax.lax.broadcasted_iota(jnp.int32, (cout, cout), 0) ==
               jax.lax.broadcasted_iota(jnp.int32, (cout, cout), 1)
               ).astype(jnp.float32)
        # (Cout, H*W) = eye @ y2^T : transpose done on the MXU (NT matmul).
        yt = jax.lax.dot_general(eye, y2, (((1,), (1,)), ((), ())),
                                 preferred_element_type=jnp.float32)
        out_ref[...] = yt[None]                              # (1, Cout, H*W)
    else:
        out_ref[...] = y[None]                               # (1, H, W*Cout)


# ---------------------------------------------------------------------------
# wrapper
# ---------------------------------------------------------------------------
def _band_weights(w_hwio, W):
    """Fold a (3,3,Cin,Cout) HWIO kernel into 3 band matrices (3, W*Cin, W*Cout).

    Wb[dy][w'*Cin+ci, w*Cout+co] = w[dy, w'-w+1, ci, co] for |w'-w| <= 1, else 0,
    so  y[h, w*Cout+co] = sum_dy (x[h+dy-1, :] @ Wb[dy])[w*Cout+co]  is the
    3x3 SAME conv with the W zero-padding built in.
    """
    bands = []
    for dy in range(3):
        m = 0.0
        for dx in range(3):
            m = m + jnp.kron(jnp.eye(W, k=1 - dx, dtype=jnp.float32),
                             w_hwio[dy, dx].astype(jnp.float32))
        bands.append(m)
    return jnp.stack(bands).astype(jnp.bfloat16)


def _bn_scale_shift(stats, gamma, beta, count):
    """Two-phase BatchNorm finalize: per-tile (sum, sum_sq) -> scale/shift (1, C)."""
    total = jnp.sum(stats[:, 0, :], axis=0)
    total_sq = jnp.sum(stats[:, 1, :], axis=0)
    mean = total / count
    var = jnp.maximum(total_sq / count - mean * mean, 0.0)   # biased (training mode)
    scale = gamma * jax.lax.rsqrt(var + EPS)
    shift = beta - mean * scale
    return scale.reshape(1, -1), shift.reshape(1, -1)


@functools.partial(jax.jit, static_argnames=("nchw_in_kernel",))
def double_conv(x_nchw, params, nchw_in_kernel=True):
    """Forward pass of DoubleConv. Input/output are NCHW (PyTorch convention)."""
    w1, b1, g1, be1, a1, w2, b2, g2, be2, a2 = params
    del b1, b2  # exact no-ops under training-mode BatchNorm (mean-subtracted)
    N, Cin, H, W = x_nchw.shape
    Cmid, Cout = w1.shape[-1], w2.shape[-1]
    count = N * H * W

    # NCHW -> lane-dense (N, H, W*Cin), bf16 MXU operand precision.
    x = jnp.transpose(x_nchw, (0, 2, 3, 1)).reshape(N, H, W * Cin).astype(jnp.bfloat16)
    wb1 = _band_weights(w1, W)                               # (3, W*Cin,  W*Cmid)
    wb2 = _band_weights(w2, W)                               # (3, W*Cmid, W*Cout)

    cparams = pltpu.CompilerParams(
        dimension_semantics=("parallel",),   # per-sample tiles are independent
        # Explicit budget with headroom; re-derive the tile for v7x's 64 MiB
        # once H-tiling lands, raise towards 64-96 MiB on v5e/v6e.
        vmem_limit_bytes=32 * 1024 * 1024,
    )

    def act_spec(wc):
        return pl.BlockSpec((1, H, wc), lambda i: (i, 0, 0))

    def bcast_spec(shape):
        nd = len(shape)
        # TODO(synk): pipeline_mode=pl.Buffered(1) for these constant-index
        # weights once channel counts (and hence weight VMEM) grow.
        return pl.BlockSpec(tuple(shape), lambda i: (0,) * nd)

    def stat_spec(c):
        return pl.BlockSpec((1, 2, c), lambda i: (i, 0, 0))

    # ---- stage 1: conv1 + per-tile (sum, sum_sq) for BatchNorm1 -------------
    act1, st1 = pl.pallas_call(
        _conv1_kernel,
        grid=(N,),
        in_specs=[act_spec(W * Cin), bcast_spec(wb1.shape)],
        out_specs=[act_spec(W * Cmid), stat_spec(Cmid)],
        out_shape=(jax.ShapeDtypeStruct((N, H, W * Cmid), jnp.bfloat16),
                   jax.ShapeDtypeStruct((N, 2, Cmid), jnp.float32)),
        compiler_params=cparams,
    )(x, wb1)
    sc1, sh1 = _bn_scale_shift(st1, g1, be1, count)

    # ---- stage 2: BN1 + PReLU1 + conv2 + per-tile stats for BatchNorm2 ------
    act2, st2 = pl.pallas_call(
        _bn_prelu_conv2_kernel,
        grid=(N,),
        in_specs=[act_spec(W * Cmid),
                  bcast_spec((1, W * Cmid)), bcast_spec((1, W * Cmid)),
                  bcast_spec((1, W * Cmid)), bcast_spec(wb2.shape)],
        out_specs=[act_spec(W * Cout), stat_spec(Cout)],
        out_shape=(jax.ShapeDtypeStruct((N, H, W * Cout), jnp.bfloat16),
                   jax.ShapeDtypeStruct((N, 2, Cout), jnp.float32)),
        compiler_params=cparams,
    )(act1, jnp.tile(sc1, (1, W)), jnp.tile(sh1, (1, W)),
      jnp.tile(a1.reshape(1, Cmid), (1, W)), wb2)
    sc2, sh2 = _bn_scale_shift(st2, g2, be2, count)

    # ---- stage 3: BN2 + PReLU2 (+ NCHW layout) -------------------------------
    if nchw_in_kernel:
        out_spec = pl.BlockSpec((1, Cout, H * W), lambda i: (i, 0, 0))
        out_shape = jax.ShapeDtypeStruct((N, Cout, H * W), jnp.float32)
    else:
        out_spec = act_spec(W * Cout)
        out_shape = jax.ShapeDtypeStruct((N, H, W * Cout), jnp.float32)
    y = pl.pallas_call(
        functools.partial(_bn_prelu_out_kernel, nchw=nchw_in_kernel),
        grid=(N,),
        in_specs=[act_spec(W * Cout),
                  bcast_spec((1, W * Cout)), bcast_spec((1, W * Cout)),
                  bcast_spec((1, W * Cout))],
        out_specs=out_spec,
        out_shape=out_shape,
        compiler_params=cparams,
    )(act2, jnp.tile(sc2, (1, W)), jnp.tile(sh2, (1, W)),
      jnp.tile(a2.reshape(1, Cout), (1, W)))

    if nchw_in_kernel:
        return y.reshape(N, Cout, H, W)                      # free reshape
    return jnp.transpose(y.reshape(N, H, W, Cout), (0, 3, 1, 2))


# ---------------------------------------------------------------------------
# parameters + reference
# ---------------------------------------------------------------------------
def init_params(key, in_ch, out_ch, mid_ch=None):
    """Deterministic synthetic parameters matching DoubleConv's shapes."""
    mid_ch = out_ch if not mid_ch else mid_ch
    ks = jax.random.split(key, 8)
    w1 = jax.random.normal(ks[0], (3, 3, in_ch, mid_ch), jnp.float32) / np.sqrt(9 * in_ch)
    b1 = 0.1 * jax.random.normal(ks[1], (mid_ch,), jnp.float32)
    g1 = 1.0 + 0.1 * jax.random.normal(ks[2], (mid_ch,), jnp.float32)   # BN weight
    be1 = 0.1 * jax.random.normal(ks[3], (mid_ch,), jnp.float32)        # BN bias
    a1 = jnp.full((mid_ch,), 0.25, jnp.float32)                         # PReLU default
    w2 = jax.random.normal(ks[4], (3, 3, mid_ch, out_ch), jnp.float32) / np.sqrt(9 * mid_ch)
    b2 = 0.1 * jax.random.normal(ks[5], (out_ch,), jnp.float32)
    g2 = 1.0 + 0.1 * jax.random.normal(ks[6], (out_ch,), jnp.float32)
    be2 = 0.1 * jax.random.normal(ks[7], (out_ch,), jnp.float32)
    a2 = jnp.full((out_ch,), 0.25, jnp.float32)
    return (w1, b1, g1, be1, a1, w2, b2, g2, be2, a2)


def _reference(x_nchw, params, conv_dtype=jnp.float32):
    """Pure-JAX/XLA reference (includes the conv biases).  conv_dtype=bfloat16
    mirrors the kernel's MXU operand precision (accumulation is f32 either way)."""
    w1, b1, g1, be1, a1, w2, b2, g2, be2, a2 = params
    x = jnp.transpose(x_nchw, (0, 2, 3, 1)).astype(jnp.float32)

    def conv(v, w, b):
        y = jax.lax.conv_general_dilated(
            v.astype(conv_dtype), w.astype(conv_dtype),
            window_strides=(1, 1), padding="SAME",
            dimension_numbers=("NHWC", "HWIO", "NHWC"),
            preferred_element_type=jnp.float32)
        return y + b

    def bn_prelu(y, g, be, a):
        m = jnp.mean(y, axis=(0, 1, 2), keepdims=True)
        v = jnp.mean((y - m) ** 2, axis=(0, 1, 2), keepdims=True)
        y = (y - m) * g * jax.lax.rsqrt(v + EPS) + be
        return jnp.where(y >= 0, y, a * y)

    y = bn_prelu(conv(x, w1, b1), g1, be1, a1)
    y = bn_prelu(conv(y, w2, b2), g2, be2, a2)
    return jnp.transpose(y, (0, 3, 1, 2))


if __name__ == "__main__":
    key = jax.random.PRNGKey(0)
    kx, kp = jax.random.split(key)

    in_ch, out_ch = 4, 8
    N, H, W = 2, 16, 16
    x = jax.random.normal(kx, (N, in_ch, H, W), jnp.float32)   # NCHW, like PyTorch
    params = init_params(kp, in_ch, out_ch)

    try:
        y = jax.block_until_ready(double_conv(x, params, nchw_in_kernel=True))
    except Exception:
        # TODO(synk): toolchains whose Mosaic lacks the (H, W*C) -> (H*W, C)
        # relayout reshape fall back to lane-dense NHWC output + one fused
        # XLA transpose pass.
        y = jax.block_until_ready(double_conv(x, params, nchw_in_kernel=False))
    assert y.shape == (N, out_ch, H, W)

    # Check against a reference with the same MXU operand precision (bf16
    # operands, f32 accumulation); tolerance covers the bf16 inter-stage
    # activation storage.
    y_ref_bf16 = _reference(x, params, conv_dtype=jnp.bfloat16)
    np.testing.assert_allclose(np.asarray(y), np.asarray(y_ref_bf16),
                               rtol=5e-2, atol=5e-2)
    # Loose check against the full-f32 module semantics (bounds bf16 drift).
    y_ref_f32 = _reference(x, params, conv_dtype=jnp.float32)
    np.testing.assert_allclose(np.asarray(y), np.asarray(y_ref_f32),
                               rtol=1e-1, atol=1e-1)

    print("KERNEL_OK")
</pallas_src>

<mosaic_0001>
module attributes {stable_mosaic.version = 11 : i64} {
  func.func @_conv1_kernel(%arg0: i32, %arg1: memref<1x16x64xbf16, #tpu.memory_space<vmem>>, %arg2: memref<3x64x128xbf16, #tpu.memory_space<vmem>>, %arg3: memref<1x16x128xbf16, #tpu.memory_space<vmem>>, %arg4: memref<1x2x8xf32, #tpu.memory_space<vmem>>) attributes {dimension_semantics = [#tpu.dimension_semantics<parallel>], iteration_bounds = array<i64: 2>, scalar_prefetch = 0 : i64, scratch_operands = 0 : i64, tpu.core_type = #tpu.core_type<tc>, window_params = [{transform_indices = @transform_0, window_bounds = array<i64: 1, 16, 64>}, {pipeline_mode = #tpu.pipeline_mode<synchronous>, transform_indices = @transform_1, window_bounds = array<i64: 3, 64, 128>}, {transform_indices = @transform_2, window_bounds = array<i64: 1, 16, 128>}, {transform_indices = @transform_3, window_bounds = array<i64: 1, 2, 8>}]} {
    %c0 = arith.constant 0 : index
    %c0_0 = arith.constant 0 : index
    %c0_1 = arith.constant 0 : index
    %0 = vector.load %arg1[%c0, %c0_0, %c0_1] : memref<1x16x64xbf16, #tpu.memory_space<vmem>>, vector<1x16x64xbf16>
    %1 = vector.shape_cast %0 : vector<1x16x64xbf16> to vector<16x64xbf16>
    %c0_2 = arith.constant 0 : index
    %c0_3 = arith.constant 0 : index
    %c0_4 = arith.constant 0 : index
    %2 = vector.load %arg2[%c0_2, %c0_3, %c0_4] : memref<3x64x128xbf16, #tpu.memory_space<vmem>>, vector<1x64x128xbf16>
    %3 = vector.shape_cast %2 : vector<1x64x128xbf16> to vector<64x128xbf16>
    %cst = arith.constant dense<0.000000e+00> : vector<16x128xf32>
    %4 = tpu.matmul %1, %3, %cst {dimension_numbers = #tpu.dot_dimension_numbers<[1], [0], [0], [1], [0, 0, 1, 1], [], []>} : vector<16x64xbf16>, vector<64x128xbf16>, vector<16x128xf32> -> vector<16x128xf32>
    %c1 = arith.constant 1 : index
    %c0_5 = arith.constant 0 : index
    %c0_6 = arith.constant 0 : index
    %5 = vector.load %arg2[%c1, %c0_5, %c0_6] : memref<3x64x128xbf16, #tpu.memory_space<vmem>>, vector<1x64x128xbf16>
    %6 = vector.shape_cast %5 : vector<1x64x128xbf16> to vector<64x128xbf16>
    %cst_7 = arith.constant dense<0.000000e+00> : vector<16x128xf32>
    %7 = tpu.matmul %1, %6, %cst_7 {dimension_numbers = #tpu.dot_dimension_numbers<[1], [0], [0], [1], [0, 0, 1, 1], [], []>} : vector<16x64xbf16>, vector<64x128xbf16>, vector<16x128xf32> -> vector<16x128xf32>
    %c2 = arith.constant 2 : index
    %c0_8 = arith.constant 0 : index
    %c0_9 = arith.constant 0 : index
    %8 = vector.load %arg2[%c2, %c0_8, %c0_9] : memref<3x64x128xbf16, #tpu.memory_space<vmem>>, vector<1x64x128xbf16>
    %9 = vector.shape_cast %8 : vector<1x64x128xbf16> to vector<64x128xbf16>
    %cst_10 = arith.constant dense<0.000000e+00> : vector<16x128xf32>
    %10 = tpu.matmul %1, %9, %cst_10 {dimension_numbers = #tpu.dot_dimension_numbers<[1], [0], [0], [1], [0, 0, 1, 1], [], []>} : vector<16x64xbf16>, vector<64x128xbf16>, vector<16x128xf32> -> vector<16x128xf32>
    %11 = tpu.iota {dimensions = array<i32: 0>} : vector<16x128xi32>
    %c0_i32 = arith.constant 0 : i32
    %12 = vector.broadcast %c0_i32 : i32 to vector<16x128xi32>
    %13 = arith.cmpi eq, %11, %12 : vector<16x128xi32>
    %c1_i32 = arith.constant 1 : i32
    %14 = tpu.dynamic_rotate %4 by %c1_i32 dim 0 : vector<16x128xf32>, i32 -> vector<16x128xf32>
    %cst_11 = arith.constant 0.000000e+00 : f32
    %15 = vector.broadcast %cst_11 : f32 to vector<16x128xf32>
    %16 = arith.select %13, %15, %14 : vector<16x128xi1>, vector<16x128xf32>
    %c15_i32 = arith.constant 15 : i32
    %17 = vector.broadcast %c15_i32 : i32 to vector<16x128xi32>
    %18 = arith.cmpi eq, %11, %17 : vector<16x128xi32>
    %c15_i32_12 = arith.constant 15 : i32
    %19 = tpu.dynamic_rotate %10 by %c15_i32_12 dim 0 : vector<16x128xf32>, i32 -> vector<16x128xf32>
    %cst_13 = arith.constant 0.000000e+00 : f32
    %20 = vector.broadcast %cst_13 : f32 to vector<16x128xf32>
    %21 = arith.select %18, %20, %19 : vector<16x128xi1>, vector<16x128xf32>
    %22 = arith.addf %7, %16 : vector<16x128xf32>
    %23 = arith.addf %22, %21 : vector<16x128xf32>
    %24 = vector.shape_cast %23 : vector<16x128xf32> to vector<1x16x128xf32>
    %25 = arith.truncf %24 : vector<1x16x128xf32> to vector<1x16x128xbf16>
    %c0_14 = arith.constant 0 : index
    %c0_15 = arith.constant 0 : index
    %c0_16 = arith.constant 0 : index
    %26 = vector.load %arg3[%c0_14, %c0_15, %c0_16] : memref<1x16x128xbf16, #tpu.memory_space<vmem>>, vector<1x16x128xbf16>
    tpu.vector_store %arg3[%c0_14, %c0_15, %c0_16], %25 {strides = array<i32>} : memref<1x16x128xbf16, #tpu.memory_space<vmem>>, vector<1x16x128xbf16>,
    %27 = tpu.iota {dimensions = array<i32: 0>} : vector<128x8xi32>
    %28 = tpu.iota {dimensions = array<i32: 1>} : vector<128x8xi32>
    %c8_i32 = arith.constant 8 : i32
    %c0_i32_17 = arith.constant 0 : i32
    %29 = arith.cmpi eq, %c8_i32, %c0_i32_17 : i32
    %c1_i32_18 = arith.constant 1 : i32
    %30 = arith.select %29, %c1_i32_18, %c8_i32 : i32
    %31 = vector.broadcast %30 : i32 to vector<128x8xi32>
    %32 = arith.remsi %27, %31 : vector<128x8xi32>
    %c0_i32_19 = arith.constant 0 : i32
    %33 = vector.broadcast %c0_i32_19 : i32 to vector<128x8xi32>
    %34 = arith.cmpi ne, %32, %33 : vector<128x8xi32>
    %c0_i32_20 = arith.constant 0 : i32
    %35 = vector.broadcast %c0_i32_20 : i32 to vector<128x8xi32>
    %36 = arith.cmpi slt, %32, %35 : vector<128x8xi32>
    %c0_i32_21 = arith.constant 0 : i32
    %37 = arith.cmpi slt, %30, %c0_i32_21 : i32
    %38 = vector.broadcast %37 : i1 to vector<128x8xi1>
    %39 = vector.broadcast %38 : vector<128x8xi1> to vector<128x8xi1>
    %40 = arith.xori %36, %39 : vector<128x8xi1>
    %41 = arith.andi %40, %34 : vector<128x8xi1>
    %42 = vector.broadcast %30 : i32 to vector<128x8xi32>
    %43 = arith.addi %32, %42 : vector<128x8xi32>
    %44 = arith.select %41, %43, %32 : vector<128x8xi1>, vector<128x8xi32>
    %45 = arith.cmpi eq, %44, %28 : vector<128x8xi32>
    %46 = arith.extui %45 : vector<128x8xi1> to vector<128x8xi32>
    %47 = arith.sitofp %46 : vector<128x8xi32> to vector<128x8xf32>
    %cst_22 = arith.constant dense<0.000000e+00> : vector<128xf32>
    %48 = vector.multi_reduction <add>, %23, %cst_22 [0] : vector<16x128xf32> to vector<128xf32>
    %49 = vector.shape_cast %48 : vector<128xf32> to vector<1x128xf32>
    %50 = arith.mulf %23, %23 : vector<16x128xf32>
    %cst_23 = arith.constant dense<0.000000e+00> : vector<128xf32>
    %51 = vector.multi_reduction <add>, %50, %cst_23 [0] : vector<16x128xf32> to vector<128xf32>
    %52 = vector.shape_cast %51 : vector<128xf32> to vector<1x128xf32>
    %53 = tpu.concatenate %49, %52 in 0 : vector<1x128xf32>, vector<1x128xf32> -> vector<2x128xf32>
    %cst_24 = arith.constant dense<0.000000e+00> : vector<2x8xf32>
    %54 = tpu.matmul %53, %47, %cst_24 {dimension_numbers = #tpu.dot_dimension_numbers<[1], [0], [0], [1], [0, 0, 1, 1], [], []>} : vector<2x128xf32>, vector<128x8xf32>, vector<2x8xf32> -> vector<2x8xf32>
    %55 = vector.shape_cast %54 : vector<2x8xf32> to vector<1x2x8xf32>
    %c0_25 = arith.constant 0 : index
    %c0_26 = arith.constant 0 : index
    %c0_27 = arith.constant 0 : index
    %56 = vector.load %arg4[%c0_25, %c0_26, %c0_27] : memref<1x2x8xf32, #tpu.memory_space<vmem>>, vector<1x2x8xf32>
    tpu.vector_store %arg4[%c0_25, %c0_26, %c0_27], %55 {strides = array<i32>} : memref<1x2x8xf32, #tpu.memory_space<vmem>>, vector<1x2x8xf32>,
    return
  }
  func.func @transform_0(%arg0: i32) -> (i32, i32, i32) {
    %c0_i32 = arith.constant 0 : i32
    %c0_i32_0 = arith.constant 0 : i32
    %c0_i32_1 = arith.constant 0 : i32
    return %arg0, %c0_i32, %c0_i32_0 : i32, i32, i32
  }
  func.func @transform_1(%arg0: i32) -> (i32, i32, i32) {
    %c0_i32 = arith.constant 0 : i32
    %c0_i32_0 = arith.constant 0 : i32
    %c0_i32_1 = arith.constant 0 : i32
    %c0_i32_2 = arith.constant 0 : i32
    return %c0_i32, %c0_i32_0, %c0_i32_1 : i32, i32, i32
  }
  func.func @transform_2(%arg0: i32) -> (i32, i32, i32) {
    %c0_i32 = arith.constant 0 : i32
    %c0_i32_0 = arith.constant 0 : i32
    %c0_i32_1 = arith.constant 0 : i32
    return %arg0, %c0_i32, %c0_i32_0 : i32, i32, i32
  }
  func.func @transform_3(%arg0: i32) -> (i32, i32, i32) {
    %c0_i32 = arith.constant 0 : i32
    %c0_i32_0 = arith.constant 0 : i32
    %c0_i32_1 = arith.constant 0 : i32
    return %arg0, %c0_i32, %c0_i32_0 : i32, i32, i32
  }
}

module attributes {stable_mosaic.version = 11 : i64} {
  func.func @_bn_prelu_conv2_kernel(%arg0: i32, %arg1: memref<1x16x128xbf16, #tpu.memory_space<vmem>>, %arg2: memref<1x128xf32, #tpu.memory_space<vmem>>, %arg3: memref<1x128xf32, #tpu.memory_space<vmem>>, %arg4: memref<1x128xf32, #tpu.memory_space<vmem>>, %arg5: memref<3x128x128xbf16, #tpu.memory_space<vmem>>, %arg6: memref<1x16x128xbf16, #tpu.memory_space<vmem>>, %arg7: memref<1x2x8xf32, #tpu.memory_space<vmem>>) attributes {dimension_semantics = [#tpu.dimension_semantics<parallel>], iteration_bounds = array<i64: 2>, scalar_prefetch = 0 : i64, scratch_operands = 0 : i64, tpu.core_type = #tpu.core_type<tc>, window_params = [{transform_indices = @transform_0, window_bounds = array<i64: 1, 16, 128>}, {pipeline_mode = #tpu.pipeline_mode<synchronous>, transform_indices = @transform_1, window_bounds = array<i64: 1, 128>}, {pipeline_mode = #tpu.pipeline_mode<synchronous>, transform_indices = @transform_2, window_bounds = array<i64: 1, 128>}, {pipeline_mode = #tpu.pipeline_mode<synchronous>, transform_indices = @transform_3, window_bounds = array<i64: 1, 128>}, {pipeline_mode = #tpu.pipeline_mode<synchronous>, transform_indices = @transform_4, window_bounds = array<i64: 3, 128, 128>}, {transform_indices = @transform_5, window_bounds = array<i64: 1, 16, 128>}, {transform_indices = @transform_6, window_bounds = array<i64: 1, 2, 8>}]} {
    %c0 = arith.constant 0 : index
    %c0_0 = arith.constant 0 : index
    %c0_1 = arith.constant 0 : index
    %0 = vector.load %arg1[%c0, %c0_0, %c0_1] : memref<1x16x128xbf16, #tpu.memory_space<vmem>>, vector<1x16x128xbf16>
    %1 = vector.shape_cast %0 : vector<1x16x128xbf16> to vector<16x128xbf16>
    %2 = arith.extf %1 : vector<16x128xbf16> to vector<16x128xf32>
    %c0_2 = arith.constant 0 : index
    %c0_3 = arith.constant 0 : index
    %3 = vector.load %arg2[%c0_2, %c0_3] : memref<1x128xf32, #tpu.memory_space<vmem>>, vector<1x128xf32>
    %4 = vector.broadcast %3 : vector<1x128xf32> to vector<16x128xf32>
    %5 = arith.mulf %2, %4 : vector<16x128xf32>
    %c0_4 = arith.constant 0 : index
    %c0_5 = arith.constant 0 : index
    %6 = vector.load %arg3[%c0_4, %c0_5] : memref<1x128xf32, #tpu.memory_space<vmem>>, vector<1x128xf32>
    %7 = vector.broadcast %6 : vector<1x128xf32> to vector<16x128xf32>
    %8 = arith.addf %5, %7 : vector<16x128xf32>
    %cst = arith.constant 0.000000e+00 : f32
    %9 = vector.broadcast %cst : f32 to vector<16x128xf32>
    %10 = arith.cmpf oge, %8, %9 : vector<16x128xf32>
    %c0_6 = arith.constant 0 : index
    %c0_7 = arith.constant 0 : index
    %11 = vector.load %arg4[%c0_6, %c0_7] : memref<1x128xf32, #tpu.memory_space<vmem>>, vector<1x128xf32>
    %12 = vector.broadcast %11 : vector<1x128xf32> to vector<16x128xf32>
    %13 = arith.mulf %12, %8 : vector<16x128xf32>
    %14 = arith.select %10, %8, %13 : vector<16x128xi1>, vector<16x128xf32>
    %15 = arith.truncf %14 : vector<16x128xf32> to vector<16x128xbf16>
    %c0_8 = arith.constant 0 : index
    %c0_9 = arith.constant 0 : index
    %c0_10 = arith.constant 0 : index
    %16 = vector.load %arg5[%c0_8, %c0_9, %c0_10] : memref<3x128x128xbf16, #tpu.memory_space<vmem>>, vector<1x128x128xbf16>
    %17 = vector.shape_cast %16 : vector<1x128x128xbf16> to vector<128x128xbf16>
    %cst_11 = arith.constant dense<0.000000e+00> : vector<16x128xf32>
    %18 = tpu.matmul %15, %17, %cst_11 {dimension_numbers = #tpu.dot_dimension_numbers<[1], [0], [0], [1], [0, 0, 1, 1], [], []>} : vector<16x128xbf16>, vector<128x128xbf16>, vector<16x128xf32> -> vector<16x128xf32>
    %c1 = arith.constant 1 : index
    %c0_12 = arith.constant 0 : index
    %c0_13 = arith.constant 0 : index
    %19 = vector.load %arg5[%c1, %c0_12, %c0_13] : memref<3x128x128xbf16, #tpu.memory_space<vmem>>, vector<1x128x128xbf16>
    %20 = vector.shape_cast %19 : vector<1x128x128xbf16> to vector<128x128xbf16>
    %cst_14 = arith.constant dense<0.000000e+00> : vector<16x128xf32>
    %21 = tpu.matmul %15, %20, %cst_14 {dimension_numbers = #tpu.dot_dimension_numbers<[1], [0], [0], [1], [0, 0, 1, 1], [], []>} : vector<16x128xbf16>, vector<128x128xbf16>, vector<16x128xf32> -> vector<16x128xf32>
    %c2 = arith.constant 2 : index
    %c0_15 = arith.constant 0 : index
    %c0_16 = arith.constant 0 : index
    %22 = vector.load %arg5[%c2, %c0_15, %c0_16] : memref<3x128x128xbf16, #tpu.memory_space<vmem>>, vector<1x128x128xbf16>
    %23 = vector.shape_cast %22 : vector<1x128x128xbf16> to vector<128x128xbf16>
    %cst_17 = arith.constant dense<0.000000e+00> : vector<16x128xf32>
    %24 = tpu.matmul %15, %23, %cst_17 {dimension_numbers = #tpu.dot_dimension_numbers<[1], [0], [0], [1], [0, 0, 1, 1], [], []>} : vector<16x128xbf16>, vector<128x128xbf16>, vector<16x128xf32> -> vector<16x128xf32>
    %25 = tpu.iota {dimensions = array<i32: 0>} : vector<16x128xi32>
    %c0_i32 = arith.constant 0 : i32
    %26 = vector.broadcast %c0_i32 : i32 to vector<16x128xi32>
    %27 = arith.cmpi eq, %25, %26 : vector<16x128xi32>
    %c1_i32 = arith.constant 1 : i32
    %28 = tpu.dynamic_rotate %18 by %c1_i32 dim 0 : vector<16x128xf32>, i32 -> vector<16x128xf32>
    %cst_18 = arith.constant 0.000000e+00 : f32
    %29 = vector.broadcast %cst_18 : f32 to vector<16x128xf32>
    %30 = arith.select %27, %29, %28 : vector<16x128xi1>, vector<16x128xf32>
    %c15_i32 = arith.constant 15 : i32
    %31 = vector.broadcast %c15_i32 : i32 to vector<16x128xi32>
    %32 = arith.cmpi eq, %25, %31 : vector<16x128xi32>
    %c15_i32_19 = arith.constant 15 : i32
    %33 = tpu.dynamic_rotate %24 by %c15_i32_19 dim 0 : vector<16x128xf32>, i32 -> vector<16x128xf32>
    %cst_20 = arith.constant 0.000000e+00 : f32
    %34 = vector.broadcast %cst_20 : f32 to vector<16x128xf32>
    %35 = arith.select %32, %34, %33 : vector<16x128xi1>, vector<16x128xf32>
    %36 = arith.addf %21, %30 : vector<16x128xf32>
    %37 = arith.addf %36, %35 : vector<16x128xf32>
    %38 = vector.shape_cast %37 : vector<16x128xf32> to vector<1x16x128xf32>
    %39 = arith.truncf %38 : vector<1x16x128xf32> to vector<1x16x128xbf16>
    %c0_21 = arith.constant 0 : index
    %c0_22 = arith.constant 0 : index
    %c0_23 = arith.constant 0 : index
    %40 = vector.load %arg6[%c0_21, %c0_22, %c0_23] : memref<1x16x128xbf16, #tpu.memory_space<vmem>>, vector<1x16x128xbf16>
    tpu.vector_store %arg6[%c0_21, %c0_22, %c0_23], %39 {strides = array<i32>} : memref<1x16x128xbf16, #tpu.memory_space<vmem>>, vector<1x16x128xbf16>,
    %41 = tpu.iota {dimensions = array<i32: 0>} : vector<128x8xi32>
    %42 = tpu.iota {dimensions = array<i32: 1>} : vector<128x8xi32>
    %c8_i32 = arith.constant 8 : i32
    %c0_i32_24 = arith.constant 0 : i32
    %43 = arith.cmpi eq, %c8_i32, %c0_i32_24 : i32
    %c1_i32_25 = arith.constant 1 : i32
    %44 = arith.select %43, %c1_i32_25, %c8_i32 : i32
    %45 = vector.broadcast %44 : i32 to vector<128x8xi32>
    %46 = arith.remsi %41, %45 : vector<128x8xi32>
    %c0_i32_26 = arith.constant 0 : i32
    %47 = vector.broadcast %c0_i32_26 : i32 to vector<128x8xi32>
    %48 = arith.cmpi ne, %46, %47 : vector<128x8xi32>
    %c0_i32_27 = arith.constant 0 : i32
    %49 = vector.broadcast %c0_i32_27 : i32 to vector<128x8xi32>
    %50 = arith.cmpi slt, %46, %49 : vector<128x8xi32>
    %c0_i32_28 = arith.constant 0 : i32
    %51 = arith.cmpi slt, %44, %c0_i32_28 : i32
    %52 = vector.broadcast %51 : i1 to vector<128x8xi1>
    %53 = vector.broadcast %52 : vector<128x8xi1> to vector<128x8xi1>
    %54 = arith.xori %50, %53 : vector<128x8xi1>
    %55 = arith.andi %54, %48 : vector<128x8xi1>
    %56 = vector.broadcast %44 : i32 to vector<128x8xi32>
    %57 = arith.addi %46, %56 : vector<128x8xi32>
    %58 = arith.select %55, %57, %46 : vector<128x8xi1>, vector<128x8xi32>
    %59 = arith.cmpi eq, %58, %42 : vector<128x8xi32>
    %60 = arith.extui %59 : vector<128x8xi1> to vector<128x8xi32>
    %61 = arith.sitofp %60 : vector<128x8xi32> to vector<128x8xf32>
    %cst_29 = arith.constant dense<0.000000e+00> : vector<128xf32>
    %62 = vector.multi_reduction <add>, %37, %cst_29 [0] : vector<16x128xf32> to vector<128xf32>
    %63 = vector.shape_cast %62 : vector<128xf32> to vector<1x128xf32>
    %64 = arith.mulf %37, %37 : vector<16x128xf32>
    %cst_30 = arith.constant dense<0.000000e+00> : vector<128xf32>
    %65 = vector.multi_reduction <add>, %64, %cst_30 [0] : vector<16x128xf32> to vector<128xf32>
    %66 = vector.shape_cast %65 : vector<128xf32> to vector<1x128xf32>
    %67 = tpu.concatenate %63, %66 in 0 : vector<1x128xf32>, vector<1x128xf32> -> vector<2x128xf32>
    %cst_31 = arith.constant dense<0.000000e+00> : vector<2x8xf32>
    %68 = tpu.matmul %67, %61, %cst_31 {dimension_numbers = #tpu.dot_dimension_numbers<[1], [0], [0], [1], [0, 0, 1, 1], [], []>} : vector<2x128xf32>, vector<128x8xf32>, vector<2x8xf32> -> vector<2x8xf32>
    %69 = vector.shape_cast %68 : vector<2x8xf32> to vector<1x2x8xf32>
    %c0_32 = arith.constant 0 : index
    %c0_33 = arith.constant 0 : index
    %c0_34 = arith.constant 0 : index
    %70 = vector.load %arg7[%c0_32, %c0_33, %c0_34] : memref<1x2x8xf32, #tpu.memory_space<vmem>>, vector<1x2x8xf32>
    tpu.vector_store %arg7[%c0_32, %c0_33, %c0_34], %69 {strides = array<i32>} : memref<1x2x8xf32, #tpu.memory_space<vmem>>, vector<1x2x8xf32>,
    return
  }
  func.func @transform_0(%arg0: i32) -> (i32, i32, i32) {
    %c0_i32 = arith.constant 0 : i32
    %c0_i32_0 = arith.constant 0 : i32
    %c0_i32_1 = arith.constant 0 : i32
    return %arg0, %c0_i32, %c0_i32_0 : i32, i32, i32
  }
  func.func @transform_1(%arg0: i32) -> (i32, i32) {
    %c0_i32 = arith.constant 0 : i32
    %c0_i32_0 = arith.constant 0 : i32
    %c0_i32_1 = arith.constant 0 : i32
    return %c0_i32, %c0_i32_0 : i32, i32
  }
  func.func @transform_2(%arg0: i32) -> (i32, i32) {
    %c0_i32 = arith.constant 0 : i32
    %c0_i32_0 = arith.constant 0 : i32
    %c0_i32_1 = arith.constant 0 : i32
    return %c0_i32, %c0_i32_0 : i32, i32
  }
  func.func @transform_3(%arg0: i32) -> (i32, i32) {
    %c0_i32 = arith.constant 0 : i32
    %c0_i32_0 = arith.constant 0 : i32
    %c0_i32_1 = arith.constant 0 : i32
    return %c0_i32, %c0_i32_0 : i32, i32
  }
  func.func @transform_4(%arg0: i32) -> (i32, i32, i32) {
    %c0_i32 = arith.constant 0 : i32
    %c0_i32_0 = arith.constant 0 : i32
    %c0_i32_1 = arith.constant 0 : i32
    %c0_i32_2 = arith.constant 0 : i32
    return %c0_i32, %c0_i32_0, %c0_i32_1 : i32, i32, i32
  }
  func.func @transform_5(%arg0: i32) -> (i32, i32, i32) {
    %c0_i32 = arith.constant 0 : i32
    %c0_i32_0 = arith.constant 0 : i32
    %c0_i32_1 = arith.constant 0 : i32
    return %arg0, %c0_i32, %c0_i32_0 : i32, i32, i32
  }
  func.func @transform_6(%arg0: i32) -> (i32, i32, i32) {
    %c0_i32 = arith.constant 0 : i32
    %c0_i32_0 = arith.constant 0 : i32
    %c0_i32_1 = arith.constant 0 : i32
    return %arg0, %c0_i32, %c0_i32_0 : i32, i32, i32
  }
}

module attributes {stable_mosaic.version = 11 : i64} {
  func.func @_bn_prelu_out_kernel(%arg0: i32, %arg1: memref<1x16x128xbf16, #tpu.memory_space<vmem>>, %arg2: memref<1x128xf32, #tpu.memory_space<vmem>>, %arg3: memref<1x128xf32, #tpu.memory_space<vmem>>, %arg4: memref<1x128xf32, #tpu.memory_space<vmem>>, %arg5: memref<1x8x256xf32, #tpu.memory_space<vmem>>) attributes {dimension_semantics = [#tpu.dimension_semantics<parallel>], iteration_bounds = array<i64: 2>, scalar_prefetch = 0 : i64, scratch_operands = 0 : i64, tpu.core_type = #tpu.core_type<tc>, window_params = [{transform_indices = @transform_0, window_bounds = array<i64: 1, 16, 128>}, {pipeline_mode = #tpu.pipeline_mode<synchronous>, transform_indices = @transform_1, window_bounds = array<i64: 1, 128>}, {pipeline_mode = #tpu.pipeline_mode<synchronous>, transform_indices = @transform_2, window_bounds = array<i64: 1, 128>}, {pipeline_mode = #tpu.pipeline_mode<synchronous>, transform_indices = @transform_3, window_bounds = array<i64: 1, 128>}, {transform_indices = @transform_4, window_bounds = array<i64: 1, 8, 256>}]} {
    %c0 = arith.constant 0 : index
    %c0_0 = arith.constant 0 : index
    %c0_1 = arith.constant 0 : index
    %0 = vector.load %arg1[%c0, %c0_0, %c0_1] : memref<1x16x128xbf16, #tpu.memory_space<vmem>>, vector<1x16x128xbf16>
    %1 = vector.shape_cast %0 : vector<1x16x128xbf16> to vector<16x128xbf16>
    %2 = arith.extf %1 : vector<16x128xbf16> to vector<16x128xf32>
    %c0_2 = arith.constant 0 : index
    %c0_3 = arith.constant 0 : index
    %3 = vector.load %arg2[%c0_2, %c0_3] : memref<1x128xf32, #tpu.memory_space<vmem>>, vector<1x128xf32>
    %4 = vector.broadcast %3 : vector<1x128xf32> to vector<16x128xf32>
    %5 = arith.mulf %2, %4 : vector<16x128xf32>
    %c0_4 = arith.constant 0 : index
    %c0_5 = arith.constant 0 : index
    %6 = vector.load %arg3[%c0_4, %c0_5] : memref<1x128xf32, #tpu.memory_space<vmem>>, vector<1x128xf32>
    %7 = vector.broadcast %6 : vector<1x128xf32> to vector<16x128xf32>
    %8 = arith.addf %5, %7 : vector<16x128xf32>
    %cst = arith.constant 0.000000e+00 : f32
    %9 = vector.broadcast %cst : f32 to vector<16x128xf32>
    %10 = arith.cmpf oge, %8, %9 : vector<16x128xf32>
    %c0_6 = arith.constant 0 : index
    %c0_7 = arith.constant 0 : index
    %11 = vector.load %arg4[%c0_6, %c0_7] : memref<1x128xf32, #tpu.memory_space<vmem>>, vector<1x128xf32>
    %12 = vector.broadcast %11 : vector<1x128xf32> to vector<16x128xf32>
    %13 = arith.mulf %12, %8 : vector<16x128xf32>
    %14 = arith.select %10, %8, %13 : vector<16x128xi1>, vector<16x128xf32>
    %15 = vector.shape_cast %14 : vector<16x128xf32> to vector<256x8xf32>
    %16 = tpu.iota {dimensions = array<i32: 0>} : vector<8x8xi32>
    %17 = tpu.iota {dimensions = array<i32: 1>} : vector<8x8xi32>
    %18 = arith.cmpi eq, %16, %17 : vector<8x8xi32>
    %19 = arith.extui %18 : vector<8x8xi1> to vector<8x8xi32>
    %20 = arith.sitofp %19 : vector<8x8xi32> to vector<8x8xf32>
    %cst_8 = arith.constant dense<0.000000e+00> : vector<8x256xf32>
    %21 = tpu.matmul %20, %15, %cst_8 {dimension_numbers = #tpu.dot_dimension_numbers<[1], [1], [0], [0], [0, 0, 1, 0], [], []>} : vector<8x8xf32>, vector<256x8xf32>, vector<8x256xf32> -> vector<8x256xf32>
    %22 = vector.shape_cast %21 : vector<8x256xf32> to vector<1x8x256xf32>
    %c0_9 = arith.constant 0 : index
    %c0_10 = arith.constant 0 : index
    %c0_11 = arith.constant 0 : index
    %23 = vector.load %arg5[%c0_9, %c0_10, %c0_11] : memref<1x8x256xf32, #tpu.memory_space<vmem>>, vector<1x8x256xf32>
    tpu.vector_store %arg5[%c0_9, %c0_10, %c0_11], %22 {strides = array<i32>} : memref<1x8x256xf32, #tpu.memory_space<vmem>>, vector<1x8x256xf32>,
    return
  }
  func.func @transform_0(%arg0: i32) -> (i32, i32, i32) {
    %c0_i32 = arith.constant 0 : i32
    %c0_i32_0 = arith.constant 0 : i32
    %c0_i32_1 = arith.constant 0 : i32
    return %arg0, %c0_i32, %c0_i32_0 : i32, i32, i32
  }
  func.func @transform_1(%arg0: i32) -> (i32, i32) {
    %c0_i32 = arith.constant 0 : i32
    %c0_i32_0 = arith.constant 0 : i32
    %c0_i32_1 = arith.constant 0 : i32
    return %c0_i32, %c0_i32_0 : i32, i32
  }
  func.func @transform_2(%arg0: i32) -> (i32, i32) {
    %c0_i32 = arith.constant 0 : i32
    %c0_i32_0 = arith.constant 0 : i32
    %c0_i32_1 = arith.constant 0 : i32
    return %c0_i32, %c0_i32_0 : i32, i32
  }
  func.func @transform_3(%arg0: i32) -> (i32, i32) {
    %c0_i32 = arith.constant 0 : i32
    %c0_i32_0 = arith.constant 0 : i32
    %c0_i32_1 = arith.constant 0 : i32
    return %c0_i32, %c0_i32_0 : i32, i32
  }
  func.func @transform_4(%arg0: i32) -> (i32, i32, i32) {
    %c0_i32 = arith.constant 0 : i32
    %c0_i32_0 = arith.constant 0 : i32
    %c0_i32_1 = arith.constant 0 : i32
    return %arg0, %c0_i32, %c0_i32_0 : i32, i32, i32
  }
}

module attributes {stable_mosaic.version = 11 : i64} {
  func.func @_conv1_kernel(%arg0: i32, %arg1: memref<1x16x64xbf16, #tpu.memory_space<vmem>>, %arg2: memref<3x64x128xbf16, #tpu.memory_space<vmem>>, %arg3: memref<1x16x128xbf16, #tpu.memory_space<vmem>>, %arg4: memref<1x2x8xf32, #tpu.memory_space<vmem>>) attributes {dimension_semantics = [#tpu.dimension_semantics<parallel>], iteration_bounds = array<i64: 2>, scalar_prefetch = 0 : i64, scratch_operands = 0 : i64, tpu.core_type = #tpu.core_type<tc>, window_params = [{transform_indices = @transform_0, window_bounds = array<i64: 1, 16, 64>}, {pipeline_mode = #tpu.pipeline_mode<synchronous>, transform_indices = @transform_1, window_bounds = array<i64: 3, 64, 128>}, {transform_indices = @transform_2, window_bounds = array<i64: 1, 16, 128>}, {transform_indices = @transform_3, window_bounds = array<i64: 1, 2, 8>}]} {
    %c0 = arith.constant 0 : index
    %c0_0 = arith.constant 0 : index
    %c0_1 = arith.constant 0 : index
    %0 = vector.load %arg1[%c0, %c0_0, %c0_1] : memref<1x16x64xbf16, #tpu.memory_space<vmem>>, vector<1x16x64xbf16>
    %1 = vector.shape_cast %0 : vector<1x16x64xbf16> to vector<16x64xbf16>
    %c0_2 = arith.constant 0 : index
    %c0_3 = arith.constant 0 : index
    %c0_4 = arith.constant 0 : index
    %2 = vector.load %arg2[%c0_2, %c0_3, %c0_4] : memref<3x64x128xbf16, #tpu.memory_space<vmem>>, vector<1x64x128xbf16>
    %3 = vector.shape_cast %2 : vector<1x64x128xbf16> to vector<64x128xbf16>
    %cst = arith.constant dense<0.000000e+00> : vector<16x128xf32>
    %4 = tpu.matmul %1, %3, %cst {dimension_numbers = #tpu.dot_dimension_numbers<[1], [0], [0], [1], [0, 0, 1, 1], [], []>} : vector<16x64xbf16>, vector<64x128xbf16>, vector<16x128xf32> -> vector<16x128xf32>
    %c1 = arith.constant 1 : index
    %c0_5 = arith.constant 0 : index
    %c0_6 = arith.constant 0 : index
    %5 = vector.load %arg2[%c1, %c0_5, %c0_6] : memref<3x64x128xbf16, #tpu.memory_space<vmem>>, vector<1x64x128xbf16>
    %6 = vector.shape_cast %5 : vector<1x64x128xbf16> to vector<64x128xbf16>
    %cst_7 = arith.constant dense<0.000000e+00> : vector<16x128xf32>
    %7 = tpu.matmul %1, %6, %cst_7 {dimension_numbers = #tpu.dot_dimension_numbers<[1], [0], [0], [1], [0, 0, 1, 1], [], []>} : vector<16x64xbf16>, vector<64x128xbf16>, vector<16x128xf32> -> vector<16x128xf32>
    %c2 = arith.constant 2 : index
    %c0_8 = arith.constant 0 : index
    %c0_9 = arith.constant 0 : index
    %8 = vector.load %arg2[%c2, %c0_8, %c0_9] : memref<3x64x128xbf16, #tpu.memory_space<vmem>>, vector<1x64x128xbf16>
    %9 = vector.shape_cast %8 : vector<1x64x128xbf16> to vector<64x128xbf16>
    %cst_10 = arith.constant dense<0.000000e+00> : vector<16x128xf32>
    %10 = tpu.matmul %1, %9, %cst_10 {dimension_numbers = #tpu.dot_dimension_numbers<[1], [0], [0], [1], [0, 0, 1, 1], [], []>} : vector<16x64xbf16>, vector<64x128xbf16>, vector<16x128xf32> -> vector<16x128xf32>
    %11 = tpu.iota {dimensions = array<i32: 0>} : vector<16x128xi32>
    %c0_i32 = arith.constant 0 : i32
    %12 = vector.broadcast %c0_i32 : i32 to vector<16x128xi32>
    %13 = arith.cmpi eq, %11, %12 : vector<16x128xi32>
    %c1_i32 = arith.constant 1 : i32
    %14 = tpu.dynamic_rotate %4 by %c1_i32 dim 0 : vector<16x128xf32>, i32 -> vector<16x128xf32>
    %cst_11 = arith.constant 0.000000e+00 : f32
    %15 = vector.broadcast %cst_11 : f32 to vector<16x128xf32>
    %16 = arith.select %13, %15, %14 : vector<16x128xi1>, vector<16x128xf32>
    %c15_i32 = arith.constant 15 : i32
    %17 = vector.broadcast %c15_i32 : i32 to vector<16x128xi32>
    %18 = arith.cmpi eq, %11, %17 : vector<16x128xi32>
    %c15_i32_12 = arith.constant 15 : i32
    %19 = tpu.dynamic_rotate %10 by %c15_i32_12 dim 0 : vector<16x128xf32>, i32 -> vector<16x128xf32>
    %cst_13 = arith.constant 0.000000e+00 : f32
    %20 = vector.broadcast %cst_13 : f32 to vector<16x128xf32>
    %21 = arith.select %18, %20, %19 : vector<16x128xi1>, vector<16x128xf32>
    %22 = arith.addf %7, %16 : vector<16x128xf32>
    %23 = arith.addf %22, %21 : vector<16x128xf32>
    %24 = vector.shape_cast %23 : vector<16x128xf32> to vector<1x16x128xf32>
    %25 = arith.truncf %24 : vector<1x16x128xf32> to vector<1x16x128xbf16>
    %c0_14 = arith.constant 0 : index
    %c0_15 = arith.constant 0 : index
    %c0_16 = arith.constant 0 : index
    %26 = vector.load %arg3[%c0_14, %c0_15, %c0_16] : memref<1x16x128xbf16, #tpu.memory_space<vmem>>, vector<1x16x128xbf16>
    tpu.vector_store %arg3[%c0_14, %c0_15, %c0_16], %25 {strides = array<i32>} : memref<1x16x128xbf16, #tpu.memory_space<vmem>>, vector<1x16x128xbf16>,
    %27 = tpu.iota {dimensions = array<i32: 0>} : vector<128x8xi32>
    %28 = tpu.iota {dimensions = array<i32: 1>} : vector<128x8xi32>
    %c8_i32 = arith.constant 8 : i32
    %c0_i32_17 = arith.constant 0 : i32
    %29 = arith.cmpi eq, %c8_i32, %c0_i32_17 : i32
    %c1_i32_18 = arith.constant 1 : i32
    %30 = arith.select %29, %c1_i32_18, %c8_i32 : i32
    %31 = vector.broadcast %30 : i32 to vector<128x8xi32>
    %32 = arith.remsi %27, %31 : vector<128x8xi32>
    %c0_i32_19 = arith.constant 0 : i32
    %33 = vector.broadcast %c0_i32_19 : i32 to vector<128x8xi32>
    %34 = arith.cmpi ne, %32, %33 : vector<128x8xi32>
    %c0_i32_20 = arith.constant 0 : i32
    %35 = vector.broadcast %c0_i32_20 : i32 to vector<128x8xi32>
    %36 = arith.cmpi slt, %32, %35 : vector<128x8xi32>
    %c0_i32_21 = arith.constant 0 : i32
    %37 = arith.cmpi slt, %30, %c0_i32_21 : i32
    %38 = vector.broadcast %37 : i1 to vector<128x8xi1>
    %39 = vector.broadcast %38 : vector<128x8xi1> to vector<128x8xi1>
    %40 = arith.xori %36, %39 : vector<128x8xi1>
    %41 = arith.andi %40, %34 : vector<128x8xi1>
    %42 = vector.broadcast %30 : i32 to vector<128x8xi32>
    %43 = arith.addi %32, %42 : vector<128x8xi32>
    %44 = arith.select %41, %43, %32 : vector<128x8xi1>, vector<128x8xi32>
    %45 = arith.cmpi eq, %44, %28 : vector<128x8xi32>
    %46 = arith.extui %45 : vector<128x8xi1> to vector<128x8xi32>
    %47 = arith.sitofp %46 : vector<128x8xi32> to vector<128x8xf32>
    %cst_22 = arith.constant dense<0.000000e+00> : vector<128xf32>
    %48 = vector.multi_reduction <add>, %23, %cst_22 [0] : vector<16x128xf32> to vector<128xf32>
    %49 = vector.shape_cast %48 : vector<128xf32> to vector<1x128xf32>
    %50 = arith.mulf %23, %23 : vector<16x128xf32>
    %cst_23 = arith.constant dense<0.000000e+00> : vector<128xf32>
    %51 = vector.multi_reduction <add>, %50, %cst_23 [0] : vector<16x128xf32> to vector<128xf32>
    %52 = vector.shape_cast %51 : vector<128xf32> to vector<1x128xf32>
    %53 = tpu.concatenate %49, %52 in 0 : vector<1x128xf32>, vector<1x128xf32> -> vector<2x128xf32>
    %cst_24 = arith.constant dense<0.000000e+00> : vector<2x8xf32>
    %54 = tpu.matmul %53, %47, %cst_24 {dimension_numbers = #tpu.dot_dimension_numbers<[1], [0], [0], [1], [0, 0, 1, 1], [], []>} : vector<2x128xf32>, vector<128x8xf32>, vector<2x8xf32> -> vector<2x8xf32>
    %55 = vector.shape_cast %54 : vector<2x8xf32> to vector<1x2x8xf32>
    %c0_25 = arith.constant 0 : index
    %c0_26 = arith.constant 0 : index
    %c0_27 = arith.constant 0 : index
    %56 = vector.load %arg4[%c0_25, %c0_26, %c0_27] : memref<1x2x8xf32, #tpu.memory_space<vmem>>, vector<1x2x8xf32>
    tpu.vector_store %arg4[%c0_25, %c0_26, %c0_27], %55 {strides = array<i32>} : memref<1x2x8xf32, #tpu.memory_space<vmem>>, vector<1x2x8xf32>,
    return
  }
  func.func @transform_0(%arg0: i32) -> (i32, i32, i32) {
    %c0_i32 = arith.constant 0 : i32
    %c0_i32_0 = arith.constant 0 : i32
    %c0_i32_1 = arith.constant 0 : i32
    return %arg0, %c0_i32, %c0_i32_0 : i32, i32, i32
  }
  func.func @transform_1(%arg0: i32) -> (i32, i32, i32) {
    %c0_i32 = arith.constant 0 : i32
    %c0_i32_0 = arith.constant 0 : i32
    %c0_i32_1 = arith.constant 0 : i32
    %c0_i32_2 = arith.constant 0 : i32
    return %c0_i32, %c0_i32_0, %c0_i32_1 : i32, i32, i32
  }
  func.func @transform_2(%arg0: i32) -> (i32, i32, i32) {
    %c0_i32 = arith.constant 0 : i32
    %c0_i32_0 = arith.constant 0 : i32
    %c0_i32_1 = arith.constant 0 : i32
    return %arg0, %c0_i32, %c0_i32_0 : i32, i32, i32
  }
  func.func @transform_3(%arg0: i32) -> (i32, i32, i32) {
    %c0_i32 = arith.constant 0 : i32
    %c0_i32_0 = arith.constant 0 : i32
    %c0_i32_1 = arith.constant 0 : i32
    return %arg0, %c0_i32, %c0_i32_0 : i32, i32, i32
  }
}

module attributes {stable_mosaic.version = 11 : i64} {
  func.func @_bn_prelu_conv2_kernel(%arg0: i32, %arg1: memref<1x16x128xbf16, #tpu.memory_space<vmem>>, %arg2: memref<1x128xf32, #tpu.memory_space<vmem>>, %arg3: memref<1x128xf32, #tpu.memory_space<vmem>>, %arg4: memref<1x128xf32, #tpu.memory_space<vmem>>, %arg5: memref<3x128x128xbf16, #tpu.memory_space<vmem>>, %arg6: memref<1x16x128xbf16, #tpu.memory_space<vmem>>, %arg7: memref<1x2x8xf32, #tpu.memory_space<vmem>>) attributes {dimension_semantics = [#tpu.dimension_semantics<parallel>], iteration_bounds = array<i64: 2>, scalar_prefetch = 0 : i64, scratch_operands = 0 : i64, tpu.core_type = #tpu.core_type<tc>, window_params = [{transform_indices = @transform_0, window_bounds = array<i64: 1, 16, 128>}, {pipeline_mode = #tpu.pipeline_mode<synchronous>, transform_indices = @transform_1, window_bounds = array<i64: 1, 128>}, {pipeline_mode = #tpu.pipeline_mode<synchronous>, transform_indices = @transform_2, window_bounds = array<i64: 1, 128>}, {pipeline_mode = #tpu.pipeline_mode<synchronous>, transform_indices = @transform_3, window_bounds = array<i64: 1, 128>}, {pipeline_mode = #tpu.pipeline_mode<synchronous>, transform_indices = @transform_4, window_bounds = array<i64: 3, 128, 128>}, {transform_indices = @transform_5, window_bounds = array<i64: 1, 16, 128>}, {transform_indices = @transform_6, window_bounds = array<i64: 1, 2, 8>}]} {
    %c0 = arith.constant 0 : index
    %c0_0 = arith.constant 0 : index
    %c0_1 = arith.constant 0 : index
    %0 = vector.load %arg1[%c0, %c0_0, %c0_1] : memref<1x16x128xbf16, #tpu.memory_space<vmem>>, vector<1x16x128xbf16>
    %1 = vector.shape_cast %0 : vector<1x16x128xbf16> to vector<16x128xbf16>
    %2 = arith.extf %1 : vector<16x128xbf16> to vector<16x128xf32>
    %c0_2 = arith.constant 0 : index
    %c0_3 = arith.constant 0 : index
    %3 = vector.load %arg2[%c0_2, %c0_3] : memref<1x128xf32, #tpu.memory_space<vmem>>, vector<1x128xf32>
    %4 = vector.broadcast %3 : vector<1x128xf32> to vector<16x128xf32>
    %5 = arith.mulf %2, %4 : vector<16x128xf32>
    %c0_4 = arith.constant 0 : index
    %c0_5 = arith.constant 0 : index
    %6 = vector.load %arg3[%c0_4, %c0_5] : memref<1x128xf32, #tpu.memory_space<vmem>>, vector<1x128xf32>
    %7 = vector.broadcast %6 : vector<1x128xf32> to vector<16x128xf32>
    %8 = arith.addf %5, %7 : vector<16x128xf32>
    %cst = arith.constant 0.000000e+00 : f32
    %9 = vector.broadcast %cst : f32 to vector<16x128xf32>
    %10 = arith.cmpf oge, %8, %9 : vector<16x128xf32>
    %c0_6 = arith.constant 0 : index
    %c0_7 = arith.constant 0 : index
    %11 = vector.load %arg4[%c0_6, %c0_7] : memref<1x128xf32, #tpu.memory_space<vmem>>, vector<1x128xf32>
    %12 = vector.broadcast %11 : vector<1x128xf32> to vector<16x128xf32>
    %13 = arith.mulf %12, %8 : vector<16x128xf32>
    %14 = arith.select %10, %8, %13 : vector<16x128xi1>, vector<16x128xf32>
    %15 = arith.truncf %14 : vector<16x128xf32> to vector<16x128xbf16>
    %c0_8 = arith.constant 0 : index
    %c0_9 = arith.constant 0 : index
    %c0_10 = arith.constant 0 : index
    %16 = vector.load %arg5[%c0_8, %c0_9, %c0_10] : memref<3x128x128xbf16, #tpu.memory_space<vmem>>, vector<1x128x128xbf16>
    %17 = vector.shape_cast %16 : vector<1x128x128xbf16> to vector<128x128xbf16>
    %cst_11 = arith.constant dense<0.000000e+00> : vector<16x128xf32>
    %18 = tpu.matmul %15, %17, %cst_11 {dimension_numbers = #tpu.dot_dimension_numbers<[1], [0], [0], [1], [0, 0, 1, 1], [], []>} : vector<16x128xbf16>, vector<128x128xbf16>, vector<16x128xf32> -> vector<16x128xf32>
    %c1 = arith.constant 1 : index
    %c0_12 = arith.constant 0 : index
    %c0_13 = arith.constant 0 : index
    %19 = vector.load %arg5[%c1, %c0_12, %c0_13] : memref<3x128x128xbf16, #tpu.memory_space<vmem>>, vector<1x128x128xbf16>
    %20 = vector.shape_cast %19 : vector<1x128x128xbf16> to vector<128x128xbf16>
    %cst_14 = arith.constant dense<0.000000e+00> : vector<16x128xf32>
    %21 = tpu.matmul %15, %20, %cst_14 {dimension_numbers = #tpu.dot_dimension_numbers<[1], [0], [0], [1], [0, 0, 1, 1], [], []>} : vector<16x128xbf16>, vector<128x128xbf16>, vector<16x128xf32> -> vector<16x128xf32>
    %c2 = arith.constant 2 : index
    %c0_15 = arith.constant 0 : index
    %c0_16 = arith.constant 0 : index
    %22 = vector.load %arg5[%c2, %c0_15, %c0_16] : memref<3x128x128xbf16, #tpu.memory_space<vmem>>, vector<1x128x128xbf16>
    %23 = vector.shape_cast %22 : vector<1x128x128xbf16> to vector<128x128xbf16>
    %cst_17 = arith.constant dense<0.000000e+00> : vector<16x128xf32>
    %24 = tpu.matmul %15, %23, %cst_17 {dimension_numbers = #tpu.dot_dimension_numbers<[1], [0], [0], [1], [0, 0, 1, 1], [], []>} : vector<16x128xbf16>, vector<128x128xbf16>, vector<16x128xf32> -> vector<16x128xf32>
    %25 = tpu.iota {dimensions = array<i32: 0>} : vector<16x128xi32>
    %c0_i32 = arith.constant 0 : i32
    %26 = vector.broadcast %c0_i32 : i32 to vector<16x128xi32>
    %27 = arith.cmpi eq, %25, %26 : vector<16x128xi32>
    %c1_i32 = arith.constant 1 : i32
    %28 = tpu.dynamic_rotate %18 by %c1_i32 dim 0 : vector<16x128xf32>, i32 -> vector<16x128xf32>
    %cst_18 = arith.constant 0.000000e+00 : f32
    %29 = vector.broadcast %cst_18 : f32 to vector<16x128xf32>
    %30 = arith.select %27, %29, %28 : vector<16x128xi1>, vector<16x128xf32>
    %c15_i32 = arith.constant 15 : i32
    %31 = vector.broadcast %c15_i32 : i32 to vector<16x128xi32>
    %32 = arith.cmpi eq, %25, %31 : vector<16x128xi32>
    %c15_i32_19 = arith.constant 15 : i32
    %33 = tpu.dynamic_rotate %24 by %c15_i32_19 dim 0 : vector<16x128xf32>, i32 -> vector<16x128xf32>
    %cst_20 = arith.constant 0.000000e+00 : f32
    %34 = vector.broadcast %cst_20 : f32 to vector<16x128xf32>
    %35 = arith.select %32, %34, %33 : vector<16x128xi1>, vector<16x128xf32>
    %36 = arith.addf %21, %30 : vector<16x128xf32>
    %37 = arith.addf %36, %35 : vector<16x128xf32>
    %38 = vector.shape_cast %37 : vector<16x128xf32> to vector<1x16x128xf32>
    %39 = arith.truncf %38 : vector<1x16x128xf32> to vector<1x16x128xbf16>
    %c0_21 = arith.constant 0 : index
    %c0_22 = arith.constant 0 : index
    %c0_23 = arith.constant 0 : index
    %40 = vector.load %arg6[%c0_21, %c0_22, %c0_23] : memref<1x16x128xbf16, #tpu.memory_space<vmem>>, vector<1x16x128xbf16>
    tpu.vector_store %arg6[%c0_21, %c0_22, %c0_23], %39 {strides = array<i32>} : memref<1x16x128xbf16, #tpu.memory_space<vmem>>, vector<1x16x128xbf16>,
    %41 = tpu.iota {dimensions = array<i32: 0>} : vector<128x8xi32>
    %42 = tpu.iota {dimensions = array<i32: 1>} : vector<128x8xi32>
    %c8_i32 = arith.constant 8 : i32
    %c0_i32_24 = arith.constant 0 : i32
    %43 = arith.cmpi eq, %c8_i32, %c0_i32_24 : i32
    %c1_i32_25 = arith.constant 1 : i32
    %44 = arith.select %43, %c1_i32_25, %c8_i32 : i32
    %45 = vector.broadcast %44 : i32 to vector<128x8xi32>
    %46 = arith.remsi %41, %45 : vector<128x8xi32>
    %c0_i32_26 = arith.constant 0 : i32
    %47 = vector.broadcast %c0_i32_26 : i32 to vector<128x8xi32>
    %48 = arith.cmpi ne, %46, %47 : vector<128x8xi32>
    %c0_i32_27 = arith.constant 0 : i32
    %49 = vector.broadcast %c0_i32_27 : i32 to vector<128x8xi32>
    %50 = arith.cmpi slt, %46, %49 : vector<128x8xi32>
    %c0_i32_28 = arith.constant 0 : i32
    %51 = arith.cmpi slt, %44, %c0_i32_28 : i32
    %52 = vector.broadcast %51 : i1 to vector<128x8xi1>
    %53 = vector.broadcast %52 : vector<128x8xi1> to vector<128x8xi1>
    %54 = arith.xori %50, %53 : vector<128x8xi1>
    %55 = arith.andi %54, %48 : vector<128x8xi1>
    %56 = vector.broadcast %44 : i32 to vector<128x8xi32>
    %57 = arith.addi %46, %56 : vector<128x8xi32>
    %58 = arith.select %55, %57, %46 : vector<128x8xi1>, vector<128x8xi32>
    %59 = arith.cmpi eq, %58, %42 : vector<128x8xi32>
    %60 = arith.extui %59 : vector<128x8xi1> to vector<128x8xi32>
    %61 = arith.sitofp %60 : vector<128x8xi32> to vector<128x8xf32>
    %cst_29 = arith.constant dense<0.000000e+00> : vector<128xf32>
    %62 = vector.multi_reduction <add>, %37, %cst_29 [0] : vector<16x128xf32> to vector<128xf32>
    %63 = vector.shape_cast %62 : vector<128xf32> to vector<1x128xf32>
    %64 = arith.mulf %37, %37 : vector<16x128xf32>
    %cst_30 = arith.constant dense<0.000000e+00> : vector<128xf32>
    %65 = vector.multi_reduction <add>, %64, %cst_30 [0] : vector<16x128xf32> to vector<128xf32>
    %66 = vector.shape_cast %65 : vector<128xf32> to vector<1x128xf32>
    %67 = tpu.concatenate %63, %66 in 0 : vector<1x128xf32>, vector<1x128xf32> -> vector<2x128xf32>
    %cst_31 = arith.constant dense<0.000000e+00> : vector<2x8xf32>
    %68 = tpu.matmul %67, %61, %cst_31 {dimension_numbers = #tpu.dot_dimension_numbers<[1], [0], [0], [1], [0, 0, 1, 1], [], []>} : vector<2x128xf32>, vector<128x8xf32>, vector<2x8xf32> -> vector<2x8xf32>
    %69 = vector.shape_cast %68 : vector<2x8xf32> to vector<1x2x8xf32>
    %c0_32 = arith.constant 0 : index
    %c0_33 = arith.constant 0 : index
    %c0_34 = arith.constant 0 : index
    %70 = vector.load %arg7[%c0_32, %c0_33, %c0_34] : memref<1x2x8xf32, #tpu.memory_space<vmem>>, vector<1x2x8xf32>
    tpu.vector_store %arg7[%c0_32, %c0_33, %c0_34], %69 {strides = array<i32>} : memref<1x2x8xf32, #tpu.memory_space<vmem>>, vector<1x2x8xf32>,
    return
  }
  func.func @transform_0(%arg0: i32) -> (i32, i32, i32) {
    %c0_i32 = arith.constant 0 : i32
    %c0_i32_0 = arith.constant 0 : i32
    %c0_i32_1 = arith.constant 0 : i32
    return %arg0, %c0_i32, %c0_i32_0 : i32, i32, i32
  }
  func.func @transform_1(%arg0: i32) -> (i32, i32) {
    %c0_i32 = arith.constant 0 : i32
    %c0_i32_0 = arith.constant 0 : i32
    %c0_i32_1 = arith.constant 0 : i32
    return %c0_i32, %c0_i32_0 : i32, i32
  }
  func.func @transform_2(%arg0: i32) -> (i32, i32) {
    %c0_i32 = arith.constant 0 : i32
    %c0_i32_0 = arith.constant 0 : i32
    %c0_i32_1 = arith.constant 0 : i32
    return %c0_i32, %c0_i32_0 : i32, i32
  }
  func.func @transform_3(%arg0: i32) -> (i32, i32) {
    %c0_i32 = arith.constant 0 : i32
    %c0_i32_0 = arith.constant 0 : i32
    %c0_i32_1 = arith.constant 0 : i32
    return %c0_i32, %c0_i32_0 : i32, i32
  }
  func.func @transform_4(%arg0: i32) -> (i32, i32, i32) {
    %c0_i32 = arith.constant 0 : i32
    %c0_i32_0 = arith.constant 0 : i32
    %c0_i32_1 = arith.constant 0 : i32
    %c0_i32_2 = arith.constant 0 : i32
    return %c0_i32, %c0_i32_0, %c0_i32_1 : i32, i32, i32
  }
  func.func @transform_5(%arg0: i32) -> (i32, i32, i32) {
    %c0_i32 = arith.constant 0 : i32
    %c0_i32_0 = arith.constant 0 : i32
    %c0_i32_1 = arith.constant 0 : i32
    return %arg0, %c0_i32, %c0_i32_0 : i32, i32, i32
  }
  func.func @transform_6(%arg0: i32) -> (i32, i32, i32) {
    %c0_i32 = arith.constant 0 : i32
    %c0_i32_0 = arith.constant 0 : i32
    %c0_i32_1 = arith.constant 0 : i32
    return %arg0, %c0_i32, %c0_i32_0 : i32, i32, i32
  }
}

module attributes {stable_mosaic.version = 11 : i64} {
  func.func @_bn_prelu_out_kernel(%arg0: i32, %arg1: memref<1x16x128xbf16, #tpu.memory_space<vmem>>, %arg2: memref<1x128xf32, #tpu.memory_space<vmem>>, %arg3: memref<1x128xf32, #tpu.memory_space<vmem>>, %arg4: memref<1x128xf32, #tpu.memory_space<vmem>>, %arg5: memref<1x16x128xf32, #tpu.memory_space<vmem>>) attributes {dimension_semantics = [#tpu.dimension_semantics<parallel>], iteration_bounds = array<i64: 2>, scalar_prefetch = 0 : i64, scratch_operands = 0 : i64, tpu.core_type = #tpu.core_type<tc>, window_params = [{transform_indices = @transform_0, window_bounds = array<i64: 1, 16, 128>}, {pipeline_mode = #tpu.pipeline_mode<synchronous>, transform_indices = @transform_1, window_bounds = array<i64: 1, 128>}, {pipeline_mode = #tpu.pipeline_mode<synchronous>, transform_indices = @transform_2, window_bounds = array<i64: 1, 128>}, {pipeline_mode = #tpu.pipeline_mode<synchronous>, transform_indices = @transform_3, window_bounds = array<i64: 1, 128>}, {transform_indices = @transform_4, window_bounds = array<i64: 1, 16, 128>}]} {
    %c0 = arith.constant 0 : index
    %c0_0 = arith.constant 0 : index
    %c0_1 = arith.constant 0 : index
    %0 = vector.load %arg1[%c0, %c0_0, %c0_1] : memref<1x16x128xbf16, #tpu.memory_space<vmem>>, vector<1x16x128xbf16>
    %1 = vector.shape_cast %0 : vector<1x16x128xbf16> to vector<16x128xbf16>
    %2 = arith.extf %1 : vector<16x128xbf16> to vector<16x128xf32>
    %c0_2 = arith.constant 0 : index
    %c0_3 = arith.constant 0 : index
    %3 = vector.load %arg2[%c0_2, %c0_3] : memref<1x128xf32, #tpu.memory_space<vmem>>, vector<1x128xf32>
    %4 = vector.broadcast %3 : vector<1x128xf32> to vector<16x128xf32>
    %5 = arith.mulf %2, %4 : vector<16x128xf32>
    %c0_4 = arith.constant 0 : index
    %c0_5 = arith.constant 0 : index
    %6 = vector.load %arg3[%c0_4, %c0_5] : memref<1x128xf32, #tpu.memory_space<vmem>>, vector<1x128xf32>
    %7 = vector.broadcast %6 : vector<1x128xf32> to vector<16x128xf32>
    %8 = arith.addf %5, %7 : vector<16x128xf32>
    %cst = arith.constant 0.000000e+00 : f32
    %9 = vector.broadcast %cst : f32 to vector<16x128xf32>
    %10 = arith.cmpf oge, %8, %9 : vector<16x128xf32>
    %c0_6 = arith.constant 0 : index
    %c0_7 = arith.constant 0 : index
    %11 = vector.load %arg4[%c0_6, %c0_7] : memref<1x128xf32, #tpu.memory_space<vmem>>, vector<1x128xf32>
    %12 = vector.broadcast %11 : vector<1x128xf32> to vector<16x128xf32>
    %13 = arith.mulf %12, %8 : vector<16x128xf32>
    %14 = arith.select %10, %8, %13 : vector<16x128xi1>, vector<16x128xf32>
    %15 = vector.shape_cast %14 : vector<16x128xf32> to vector<1x16x128xf32>
    %c0_8 = arith.constant 0 : index
    %c0_9 = arith.constant 0 : index
    %c0_10 = arith.constant 0 : index
    %16 = vector.load %arg5[%c0_8, %c0_9, %c0_10] : memref<1x16x128xf32, #tpu.memory_space<vmem>>, vector<1x16x128xf32>
    tpu.vector_store %arg5[%c0_8, %c0_9, %c0_10], %15 {strides = array<i32>} : memref<1x16x128xf32, #tpu.memory_space<vmem>>, vector<1x16x128xf32>,
    return
  }
  func.func @transform_0(%arg0: i32) -> (i32, i32, i32) {
    %c0_i32 = arith.constant 0 : i32
    %c0_i32_0 = arith.constant 0 : i32
    %c0_i32_1 = arith.constant 0 : i32
    return %arg0, %c0_i32, %c0_i32_0 : i32, i32, i32
  }
  func.func @transform_1(%arg0: i32) -> (i32, i32) {
    %c0_i32 = arith.constant 0 : i32
    %c0_i32_0 = arith.constant 0 : i32
    %c0_i32_1 = arith.constant 0 : i32
    return %c0_i32, %c0_i32_0 : i32, i32
  }
  func.func @transform_2(%arg0: i32) -> (i32, i32) {
    %c0_i32 = arith.constant 0 : i32
    %c0_i32_0 = arith.constant 0 : i32
    %c0_i32_1 = arith.constant 0 : i32
    return %c0_i32, %c0_i32_0 : i32, i32
  }
  func.func @transform_3(%arg0: i32) -> (i32, i32) {
    %c0_i32 = arith.constant 0 : i32
    %c0_i32_0 = arith.constant 0 : i32
    %c0_i32_1 = arith.constant 0 : i32
    return %c0_i32, %c0_i32_0 : i32, i32
  }
  func.func @transform_4(%arg0: i32) -> (i32, i32, i32) {
    %c0_i32 = arith.constant 0 : i32
    %c0_i32_0 = arith.constant 0 : i32
    %c0_i32_1 = arith.constant 0 : i32
    return %arg0, %c0_i32, %c0_i32_0 : i32, i32, i32
  }
}

</mosaic_0001>

<bundles_post_ra>
// kernel: double_conv.3
= control target key start
LH: loop header
LB: loop body
LE: loop exit
PB: predicated region body
PF: predicated region fallthrough
CT: control target
= control target key end

     0   :  { %s1151_s12 = smov 0   ;;  %s1273_s0 = inlined_call_operand.vmem [shape: bf16[2,16,64], index: 0, kind: input, shape index: {}]   ;;  %s1274_s1 = inlined_call_operand.vmem [shape: bf16[3,64,128], index: 1, kind: input, shape index: {}]   ;;  %s1275_s2 = inlined_call_operand.vmem [shape: bf16[2,16,128], index: 2, kind: output, shape index: {0}]   ;;  %s1276_s3 = inlined_call_operand.vmem [shape: f32[2,2,8], index: 3, kind: output, shape index: {1}]  }
   0x1 LB: > { %s880_s13 = sadd.s32 4294967295, %s1125_s12   ;;  %p884_p0 = scmp.ge.s32.totalorder %s1125_s12, 1  ;;  %s1125_s12 = sphi %s1151_s12, %s14_s12  }
   0x2   : > { %p140_p1 = scmp.lt.s32.totalorder %s1125_s12, 3 }
   0x4   : > { %p141_p2 = pnand %p884_p0, %p140_p1 }
   0x5   : > { %v1106_v0 = vld [vmem:[%s1274_s1] sm:$0xff] (!%p141_p2)   ;;  %v1127_v1 = vmov (!%p141_p2), 0.0   ;;  %v1107_v2 = vld [vmem:[%s1274_s1 + $0x8] sm:$0xff] (!%p141_p2)   ;;  %vm1128_vm0 = vmmov (!%p141_p2), 0   ;;  %p168_p3 = scmp.lt.s32.totalorder (!%p141_p2), %s880_s13, 1  ;;  %v1108_v5 = vld [vmem:[%s1274_s1 + $0x10] sm:$0xff] (!%p141_p2)   ;;  %v350_v14 = vlaneseq (!%p141_p2) }
   0x6   : > { %144 = sbr.rel (%p141_p2) target bundleno = 486 (0x1e6), region = 28  ;;  %999 = vmatprep.subr.bf16.mxu0 (!%p141_p2), %v1127_v1  ;;  %1011 = vmatprep.subr.bf16.mxu1 (!%p141_p2), %v1127_v1  ;;  %v1109_v3 = vld [vmem:[%s1274_s1 + $0x40] sm:$0xff] (!%p141_p2)   ;;  %v1112_v4 = vld [vmem:[%s1274_s1 + $0x48] sm:$0xff] (!%p141_p2)   ;;  %v1114_v6 = vld [vmem:[%s1274_s1 + $0x50] sm:$0xff] (!%p141_p2)   ;;  %vm222_vm1 = vcmask (!%p141_p2), 523264   ;;  %v1129_v19 = vmov (!%p141_p2), 0.0|0.0  }
   0x7   : > { %1000 = vmatpush3.bf16.msra.mxu0 (!%p141_p2), %v1106_v0  ;;  %1007 = vmatprep.mubr.msk.bf16.mxu0 (!%p141_p2), %vm1128_vm0, %v1127_v1  ;;  %v1110_v7 = vld [vmem:[%s1274_s1 + $0x18] sm:$0xff] (!%p141_p2)   ;;  %v1113_v10 = vld [vmem:[%s1274_s1 + $0x20] sm:$0xff] (!%p141_p2)   ;;  %v1115_v11 = vld [vmem:[%s1274_s1 + $0x28] sm:$0xff] (!%p141_p2)   ;;  %v1210_v15 = vshrl.u32 (!%p141_p2), %v350_v14, 7  ;;  %v1215_v17 = vand.u32 (!%p141_p2), 127, %v350_v14 }
   0x8   : > { %1001 = vmatprep.subr.bf16.mxu0 (!%p141_p2), %v1127_v1  ;;  %1019 = vmatprep.mubr.msk.bf16.mxu1 (!%p141_p2), %vm1128_vm0, %v1127_v1  ;;  %v1116_v9 = vld [vmem:[%s1274_s1 + $0x58] sm:$0xff] (!%p141_p2)   ;;  %v1117_v12 = vld [vmem:[%s1274_s1 + $0x30] sm:$0xff] (!%p141_p2)   ;;  %v1130_v25 = vmov (!%p141_p2), 1.0|1.0  }
   0x9   : > { %1012 = vmatpush3.bf16.msra.mxu1 (!%p141_p2), %v1109_v3  ;;  %v1118_v13 = vld [vmem:[%s1274_s1 + $0x38] sm:$0xff] (!%p141_p2)   ;;  %v1213_v16 = vadd.s32 (!%p141_p2), 8, %v1210_v15  ;;  %v468_v18 = vand.u32 (!%p141_p2), 7, %v1210_v15  ;;  %v448_v21 = vadd.s32 (!%p141_p2), 16, %v1210_v15  ;;  %v449_v22 = vadd.s32 (!%p141_p2), 24, %v1210_v15 }
   0xa   : > { %1013 = vmatprep.subr.bf16.mxu1 (!%p141_p2), %v1127_v1  ;;  %v450_v26 = vadd.s32 (!%p141_p2), 32, %v1210_v15  ;;  %v451_v27 = vadd.s32 (!%p141_p2), 40, %v1210_v15  ;;  %v452_v30 = vadd.s32 (!%p141_p2), 48, %v1210_v15  ;;  %v453_v31 = vadd.s32 (!%p141_p2), 56, %v1210_v15 }
   0xb   : > { %1002 = vmatpush3.bf16.msra.mxu0 (!%p141_p2), %v1107_v2  ;;  %v475_v20 = vand.u32 (!%p141_p2), 7, %v1213_v16  ;;  %vm656_vm2 = vcmp.eq.s32.totalorder (!%p141_p2), %v468_v18, %v1215_v17  ;;  %v482_v23 = vand.u32 (!%p141_p2), 7, %v448_v21  ;;  %v489_v24 = vand.u32 (!%p141_p2), 7, %v449_v22 }
   0xc   : > { %1003 = vmatprep.subr.bf16.mxu0 (!%p141_p2), %v1127_v1  ;;  %v496_v28 = vand.u32 (!%p141_p2), 7, %v450_v26  ;;  %v503_v29 = vand.u32 (!%p141_p2), 7, %v451_v27  ;;  %v510_v32 = vand.u32 (!%p141_p2), 7, %v452_v30  ;;  %v517_v33 = vand.u32 (!%p141_p2), 7, %v453_v31 }
   0xd   : > { %s1278_s13 = smov (!%p168_p3, %s880_s13), 1  ;;  %1014 = vmatpush3.bf16.msra.mxu1 %v1112_v4  ;;  %vm657_vm3 = vcmp.eq.s32.totalorder %v475_v20, %v1215_v17  ;;  %vm658_vm5 = vcmp.eq.s32.totalorder %v482_v23, %v1215_v17  ;;  %vm659_vm6 = vcmp.eq.s32.totalorder %v489_v24, %v1215_v17  ;;  %v454_v34 = vadd.s32 64, %v1210_v15 }
   0xe   : > { %s958_s24 = sshll.u32 %s1278_s13, 3  ;;  %1015 = vmatprep.subr.bf16.mxu1 %v1127_v1  ;;  %vm1071_vm4 = vmpackc.low %vm657_vm3, %vm656_vm2  ;;  %vm660_vm8 = vcmp.eq.s32.totalorder %v496_v28, %v1215_v17  ;;  %vm661_vm9 = vcmp.eq.s32.totalorder %v503_v29, %v1215_v17  ;;  %vm662_vm11 = vcmp.eq.s32.totalorder %v510_v32, %v1215_v17  ;;  %vm663_vm12 = vcmp.eq.s32.totalorder %v517_v33, %v1215_v17  ;;  %s889_s20 = sshll.u32 %s1278_s13, 1 }
   0xf   : > { %s172_s27 = scalar_lea.vmem %s1273_s0, %s958_s24  ;;  %1004 = vmatpush3.bf16.msra.mxu0 %v1108_v5  ;;  %vm1074_vm7 = vmpackc.low %vm659_vm6, %vm658_vm5  ;;  %v455_v35 = vadd.s32 72, %v1210_v15  ;;  %v524_v36 = vand.u32 7, %v454_v34  ;;  %v456_v38 = vadd.s32 80, %v1210_v15  ;;  %v457_v39 = vadd.s32 88, %v1210_v15  ;;  %s177_s19 = scalar_lea.vmem %s1275_s2, %s958_s24 }
  0x10   : > { %1005 = vmatprep.subr.bf16.mxu0 %v1127_v1  ;;  %v1111_v8 = vld [vmem:[%s172_s27] sm:$0xff]   ;;  %vm1077_vm10 = vmpackc.low %vm661_vm9, %vm660_vm8  ;;  %v458_v42 = vadd.s32 96, %v1210_v15  ;;  %v459_v43 = vadd.s32 104, %v1210_v15  ;;  %v460_v46 = vadd.s32 112, %v1210_v15  ;;  %v461_v47 = vadd.s32 120, %v1210_v15  ;;  %s181_s23 = scalar_lea.vmem %s1276_s3, %s889_s20 }
  0x11   : > { %1016 = vmatpush3.bf16.msra.mxu1 %v1114_v6  ;;  %vm1080_vm13 = vmpackc.low %vm663_vm12, %vm662_vm11  ;;  %v531_v37 = vand.u32 7, %v455_v35  ;;  %vm664_vm14 = vcmp.eq.s32.totalorder %v524_v36, %v1215_v17  ;;  %v538_v40 = vand.u32 7, %v456_v38  ;;  %v545_v41 = vand.u32 7, %v457_v39 }
  0x12   : > { %1017 = vmatprep.subr.bf16.mxu1 %v1127_v1  ;;  %v552_v44 = vand.u32 7, %v458_v42  ;;  %v559_v45 = vand.u32 7, %v459_v43  ;;  %v566_v48 = vand.u32 7, %v460_v46  ;;  %v573_v49 = vand.u32 7, %v461_v47 }
  0x13   : > { %1006 = vmatpush3.bf16.msra.mxu0 %v1110_v7  ;;  %vm665_vm15 = vcmp.eq.s32.totalorder %v531_v37, %v1215_v17  ;;  %vm667_vm2 = vcmp.eq.s32.totalorder %v545_v41, %v1215_v17  ;;  %vm353_vm11 = vcmp.eq.s32.totalorder %v1210_v15, 0  ;;  %vm366_vm12 = vcmp.lt.s32.totalorder %v1210_v15, 7 }
  0x14   : > { %1023 = vmatprep.subr.bf16.mxu0 %v1127_v1  ;;  %vm669_vm5 = vcmp.eq.s32.totalorder %v559_v45, %v1215_v17  ;;  %vm671_vm8 = vcmp.eq.s32.totalorder %v573_v49, %v1215_v17 }
  0x15   : > { %1018 = vmatpush3.bf16.msra.mxu1 %v1116_v9 }
  0x16   : > { %1008 = vmatmul.mubr.msk.bf16.vlgmr.msra.gmra.mrb[0].mxu0 %vm222_vm1, %v1111_v8  ;;  %1070 = vmatprep.subr.bf16.mxu1 %v1129_v19 }
  0x17   : > { %1024 = vmatpush3.bf16.msra.mxu0 %v1113_v10  ;;  %1031 = vmatprep.mubr.msk.bf16.mxu0 %vm1128_vm0, %v1127_v1 }
  0x18   : > { %1025 = vmatprep.subr.bf16.mxu0 %v1127_v1  ;;  %1020 = vmatmul.mubr.msk.bf16.vlgmr.msra.gmra.mrb[0].mxu1 %vm222_vm1, %v1111_v8 }
  0x19   : > { %1067 = vmatprep.mubr.msk.f32.mxu1 %vm1128_vm0, %v1127_v1  ;;  %1072 = vmatpush3.bf16.msk.msra.mxu1 %vm1071_vm4, %v1130_v25  ;;  %vm1083_vm0 = vmpackc.low %vm665_vm15, %vm664_vm14  ;;  %vm668_vm4 = vcmp.eq.s32.totalorder %v552_v44, %v1215_v17  ;;  %vm720_vm14 = vcmask 1040384   ;;  %vm792_vm15 = vcmask 58368  }
  0x1a   : > { %1073 = vmatprep.subr.bf16.mxu1 %v1129_v19  ;;  %vm1089_vm6 = vmpackc.low %vm669_vm5, %vm668_vm4 }
  0x1b   : > { %1026 = vmatpush3.bf16.msra.mxu0 %v1115_v11 }
  0x1c   : > { %1027 = vmatprep.subr.bf16.mxu0 %v1127_v1 }
  0x1d   : > { %1075 = vmatpush3.bf16.msk.msra.mxu1 %vm1074_vm7, %v1130_v25  ;;  %vm670_vm7 = vcmp.eq.s32.totalorder %v566_v48, %v1215_v17 }
  0x1e   : > { %1076 = vmatprep.subr.bf16.mxu1 %v1129_v19  ;;  %vm1092_vm9 = vmpackc.low %vm671_vm8, %vm670_vm7 }
  0x1f   : > { %1028 = vmatpush3.bf16.msra.mxu0 %v1117_v12 }
  0x20   : > { %1029 = vmatprep.subr.bf16.mxu0 %v1127_v1 }
  0x21   : > { %1078 = vmatpush3.bf16.msk.msra.mxu1 %vm1077_vm10, %v1130_v25  ;;  %vm357_vm10 = vcmp.lt.s32.totalorder %v1210_v15, 1 }
  0x22   : > { %1079 = vmatprep.subr.bf16.mxu1 %v1129_v19 }
  0x23   : > { %1030 = vmatpush3.bf16.msra.mxu0 %v1118_v13 }
  0x25   : > { %1081 = vmatpush3.bf16.msk.msra.mxu1 %vm1080_vm13, %v1130_v25  ;;  %vm363_vm13 = vcmp.eq.s32.totalorder %v1213_v16, 15 }
  0x26   : > { %1032 = vmatmul.mubr.msk.bf16.vlgmr.msra.gmra.mrb[4].mxu0 %vm222_vm1, %v1111_v8  ;;  %1082 = vmatprep.subr.bf16.mxu1 %v1129_v19  ;;  %vm666_vm1 = vcmp.eq.s32.totalorder %v538_v40, %v1215_v17 }
  0x27   : > { %vm1086_vm3 = vmpackc.low %vm667_vm2, %vm666_vm1 }
  0x29   : > { %1084 = vmatpush3.bf16.msk.msra.mxu1 %vm1083_vm0, %v1130_v25 }
  0x2a   : > { %1085 = vmatprep.subr.bf16.mxu1 %v1129_v19 }
  0x2d   : > { %1087 = vmatpush3.bf16.msk.msra.mxu1 %vm1086_vm3, %v1130_v25 }
  0x2e   : > { %1088 = vmatprep.subr.bf16.mxu1 %v1129_v19 }
  0x31   : > { %1090 = vmatpush3.bf16.msk.msra.mxu1 %vm1089_vm6, %v1130_v25 }
  0x32   : > { %1091 = vmatprep.subr.bf16.mxu1 %v1129_v19 }
  0x35   : > { %1093 = vmatpush3.bf16.msk.msra.mxu1 %vm1092_vm9, %v1130_v25 }
  0xe9   : > { %v260_v50 = vpop.f32.mrb[0].mxu0 }
  0xea   : > { %v355_v51 = vrot.slane %v260_v50, 7  ;;  %v1009_v52 = vpop.f32.mrb[1].mxu0 }
  0xeb   : > { %v263_v53 = vpop.f32.mrb[2].mxu0  ;;  %v343_v56 = vpop.f32.mrb[0].mxu1 }
  0xec   : > { %v356_v54 = vrot.slane %v263_v53, 7  ;;  %v1010_v55 = vpop.f32.mrb[3].mxu0  ;;  %v364_v57 = vrot.slane %v343_v56, 1  ;;  %v1021_v58 = vpop.f32.mrb[1].mxu1 }
  0xed   : > { %v346_v59 = vpop.f32.mrb[2].mxu1 }
  0xee   : > { %v359_v60 = vsel %vm357_vm10, %v356_v54, %v355_v51  ;;  %v358_v61 = vsel %vm357_vm10, %v355_v51, %v356_v54  ;;  %v365_v62 = vrot.slane %v346_v59, 1  ;;  %v1022_v63 = vpop.f32.mrb[3].mxu1 }
  0xef   : > { %v360_v0 = vsel %vm353_vm11, 0.0, %v359_v60 }
  0xf0   : > { %v367_v1 = vsel %vm366_vm12, %v364_v57, %v365_v62  ;;  %v368_v2 = vsel %vm366_vm12, %v365_v62, %v364_v57 }
  0xf1   : > { %v370_v3 = vsel %vm363_vm13, 0.0, %v368_v2 }
  0xf9   : > { %v429_v4 = vpop.f32.mrb[4].mxu0 }
  0xfa   : > { %v430_v5 = vadd.f32 %v429_v4, %v360_v0  ;;  %v1033_v6 = vpop.f32.mrb[5].mxu0 }
  0xfb   : > { %v432_v7 = vpop.f32.mrb[6].mxu0 }
  0xfc   : > { %v436_v8 = vadd.f32 %v430_v5, %v367_v1  ;;  %v433_v9 = vadd.f32 %v432_v7, %v358_v61  ;;  %v1034_v10 = vpop.f32.mrb[7].mxu0 }
  0xfe   : > { %v437_v11 = vadd.f32 %v433_v9, %v370_v3  ;;  %v711_v12 = vmul.f32 %v436_v8, %v436_v8 }
 0x100   : > { %v965_v13 = vpack.c.bf16 %v437_v11, %v436_v8  ;;  %v704_v14 = vadd.f32 %v437_v11, %v436_v8  ;;  %v712_v15 = vmul.f32 %v437_v11, %v437_v11 }
 0x102   : > { %966 = vst [vmem:[%s177_s19] sm:$0xff] %v965_v13   ;;  %v705_v16 = vrot.slane %v704_v14, 4  ;;  %v713_v17 = vadd.f32 %v712_v15, %v711_v12 }
 0x104   : > { %v706_v18 = vadd.f32 %v705_v16, %v704_v14  ;;  %v714_v19 = vrot.slane %v713_v17, 4 }
 0x106   : > { %v707_v20 = vrot.slane %v706_v18, 2  ;;  %v715_v21 = vadd.f32 %v714_v19, %v713_v17 }
 0x108   : > { %v708_v22 = vadd.f32 %v707_v20, %v706_v18  ;;  %v716_v23 = vrot.slane %v715_v21, 2 }
 0x10a   : > { %v709_v24 = vrot.slane %v708_v22, 1  ;;  %v717_v25 = vadd.f32 %v716_v23, %v715_v21 }
 0x10c   : > { %v718_v26 = vrot.slane %v717_v25, 1  ;;  %v710_v27 = vadd.f32 %v709_v24, %v708_v22 }
 0x10e   : > { %v719_v28 = vadd.f32 %v718_v26, %v717_v25 }
 0x110   : > { %v721_v29 = vsel %vm720_vm14, %v710_v27, %v719_v28 }
 0x111   : > { %1068 = vmatmul.mubr.f32.vlgmr.msra.gmra.mrb[4].mxu1 %v721_v29 }
 0x1e4   : > { %v788_v30 = vpop.f32.mrb[4].mxu1 }
 0x1e5   : > { %793 = vst.msk [vmem:[%s181_s23] sm:$0x3] %vm792_vm15, %v788_v30  ;;  %v1069_v31 = vpop.f32.mrb[5].mxu1 }
 0x1e6 PF: > { %s14_s12 = sadd.s32 1, %s1125_s12  }
 0x1e7   : > { %p11_p4 = scmp.ge.s32.totalorder %s14_s12, 4  }
 0x1e9   :  { %13 = sbr.rel (!%p11_p4) target bundleno = 1 (0x1), region = 72 }

// kernel: double_conv.4
= control target key start
LH: loop header
LB: loop body
LE: loop exit
PB: predicated region body
PF: predicated region fallthrough
CT: control target
= control target key end

     0   :  { %s1446_s21 = smov 0   ;;  %s1646_s0 = inlined_call_operand.vmem [shape: bf16[2,16,128], index: 0, kind: input, shape index: {}]   ;;  %s1647_s1 = inlined_call_operand.vmem [shape: f32[1,128], index: 1, kind: input, shape index: {}]   ;;  %s1648_s2 = inlined_call_operand.vmem [shape: f32[1,128], index: 2, kind: input, shape index: {}]   ;;  %s1649_s3 = inlined_call_operand.vmem [shape: f32[1,128], index: 3, kind: input, shape index: {}]   ;;  %s1650_s4 = inlined_call_operand.vmem [shape: bf16[3,128,128], index: 4, kind: input, shape index: {}]   ;;  %s1651_s5 = inlined_call_operand.vmem [shape: bf16[2,16,128], index: 5, kind: output, shape index: {0}]   ;;  %s1652_s6 = inlined_call_operand.vmem [shape: f32[2,2,8], index: 6, kind: output, shape index: {1}]  }
   0x1 LB: > { %s1082_s22 = sadd.s32 4294967295, %s1405_s21   ;;  %p1086_p0 = scmp.ge.s32.totalorder %s1405_s21, 1  ;;  %s1405_s21 = sphi %s1446_s21, %s17_s21  }
   0x2   : > { %p215_p1 = scmp.lt.s32.totalorder %s1405_s21, 3 }
   0x4   : > { %p216_p2 = pnand %p1086_p0, %p215_p1 }
   0x5   : > { %v1375_v0 = vld [vmem:[%s1650_s4] sm:$0xff] (!%p216_p2)   ;;  %v1407_v1 = vmov (!%p216_p2), 0.0   ;;  %v1376_v2 = vld [vmem:[%s1650_s4 + $0x8] sm:$0xff] (!%p216_p2)   ;;  %vm1408_vm0 = vmmov (!%p216_p2), 0   ;;  %p249_p3 = scmp.lt.s32.totalorder (!%p216_p2), %s1082_s22, 1  ;;  %v1377_v3 = vld [vmem:[%s1650_s4 + $0x10] sm:$0xff] (!%p216_p2)   ;;  %v528_v40 = vlaneseq (!%p216_p2) }
   0x6   : > { %219 = sbr.rel (%p216_p2) target bundleno = 518 (0x206), region = 40  ;;  %1244 = vmatprep.subr.bf16.mxu0 (!%p216_p2), %v1407_v1  ;;  %1264 = vmatprep.subr.bf16.mxu1 (!%p216_p2), %v1407_v1  ;;  %v1382_v4 = vld [vmem:[%s1650_s4 + $0x80] sm:$0xff] (!%p216_p2)   ;;  %v1378_v5 = vld [vmem:[%s1650_s4 + $0x18] sm:$0xff] (!%p216_p2)   ;;  %v1384_v10 = vld [vmem:[%s1650_s4 + $0x88] sm:$0xff] (!%p216_p2)   ;;  %v1409_v43 = vmov (!%p216_p2), 0.0|0.0  }
   0x7   : > { %1245 = vmatpush3.bf16.msra.mxu0 (!%p216_p2), %v1375_v0  ;;  %1260 = vmatprep.mubr.msk.bf16.mxu0 (!%p216_p2), %vm1408_vm0, %v1407_v1  ;;  %v1092_v9 = vld [vmem:[%s1647_s1] ss:$0 sm:$0xff] (!%p216_p2)  ;;  %v1386_v11 = vld [vmem:[%s1650_s4 + $0x90] sm:$0xff] (!%p216_p2)   ;;  %v1388_v16 = vld [vmem:[%s1650_s4 + $0x98] sm:$0xff] (!%p216_p2)   ;;  %v1575_v41 = vshrl.u32 (!%p216_p2), %v528_v40, 7  ;;  %v1577_v42 = vand.u32 (!%p216_p2), 127, %v528_v40 }
   0x8   : > { %1246 = vmatprep.subr.bf16.mxu0 (!%p216_p2), %v1407_v1  ;;  %1280 = vmatprep.mubr.msk.bf16.mxu1 (!%p216_p2), %vm1408_vm0, %v1407_v1  ;;  %v1379_v12 = vld [vmem:[%s1650_s4 + $0x20] sm:$0xff] (!%p216_p2)   ;;  %v1380_v17 = vld [vmem:[%s1650_s4 + $0x28] sm:$0xff] (!%p216_p2)   ;;  %v1381_v22 = vld [vmem:[%s1650_s4 + $0x30] sm:$0xff] (!%p216_p2)   ;;  %v1410_v47 = vmov (!%p216_p2), 1.0|1.0  }
   0x9   : > { %1265 = vmatpush3.bf16.msra.mxu1 (!%p216_p2), %v1382_v4  ;;  %v1093_v15 = vld [vmem:[%s1648_s2] ss:$0 sm:$0xff] (!%p216_p2)  ;;  %v1392_v25 = vld [vmem:[%s1650_s4 + $0xa8] sm:$0xff] (!%p216_p2)   ;;  %v1383_v26 = vld [vmem:[%s1650_s4 + $0x38] sm:$0xff] (!%p216_p2)   ;;  %v1581_v44 = vadd.s32 (!%p216_p2), 8, %v1575_v41  ;;  %v670_v45 = vand.u32 (!%p216_p2), 7, %v1575_v41 }
   0xa   : > { %1266 = vmatprep.subr.bf16.mxu1 (!%p216_p2), %v1407_v1  ;;  %v1094_v20 = vld [vmem:[%s1649_s3] ss:$0 sm:$0xff] (!%p216_p2)  ;;  %v1394_v30 = vld [vmem:[%s1650_s4 + $0xb0] sm:$0xff] (!%p216_p2)   ;;  %v1396_v32 = vld [vmem:[%s1650_s4 + $0xb8] sm:$0xff] (!%p216_p2)   ;;  %v650_v48 = vadd.s32 (!%p216_p2), 16, %v1575_v41  ;;  %v651_v49 = vadd.s32 (!%p216_p2), 24, %v1575_v41 }
   0xb   : > { %1247 = vmatpush3.bf16.msra.mxu0 (!%p216_p2), %v1376_v2  ;;  %v1390_v21 = vld [vmem:[%s1650_s4 + $0xa0] sm:$0xff] (!%p216_p2)   ;;  %v1387_v33 = vld [vmem:[%s1650_s4 + $0x48] sm:$0xff] (!%p216_p2)   ;;  %v1389_v34 = vld [vmem:[%s1650_s4 + $0x50] sm:$0xff] (!%p216_p2)   ;;  %v677_v46 = vand.u32 (!%p216_p2), 7, %v1581_v44  ;;  %vm858_vm3 = vcmp.eq.s32.totalorder (!%p216_p2), %v670_v45, %v1577_v42  ;;  %v652_v52 = vadd.s32 (!%p216_p2), 32, %v1575_v41  ;;  %v653_v53 = vadd.s32 (!%p216_p2), 40, %v1575_v41 }
   0xc   : > { %1248 = vmatprep.subr.bf16.mxu0 (!%p216_p2), %v1407_v1  ;;  %v1385_v31 = vld [vmem:[%s1650_s4 + $0x40] sm:$0xff] (!%p216_p2)   ;;  %v1391_v35 = vld [vmem:[%s1650_s4 + $0x58] sm:$0xff] (!%p216_p2)   ;;  %v1395_v37 = vld [vmem:[%s1650_s4 + $0x68] sm:$0xff] (!%p216_p2)   ;;  %v684_v50 = vand.u32 (!%p216_p2), 7, %v650_v48  ;;  %v691_v51 = vand.u32 (!%p216_p2), 7, %v651_v49  ;;  %v654_v56 = vadd.s32 (!%p216_p2), 48, %v1575_v41 }
   0xd   : > { %s1654_s22 = smov (!%p249_p3, %s1082_s22), 1  ;;  %1267 = vmatpush3.bf16.msra.mxu1 %v1384_v10  ;;  %v1393_v36 = vld [vmem:[%s1650_s4 + $0x60] sm:$0xff]   ;;  %v1397_v38 = vld [vmem:[%s1650_s4 + $0x70] sm:$0xff]   ;;  %v1398_v39 = vld [vmem:[%s1650_s4 + $0x78] sm:$0xff]   ;;  %vm859_vm4 = vcmp.eq.s32.totalorder %v677_v46, %v1577_v42  ;;  %v698_v54 = vand.u32 7, %v652_v52  ;;  %v705_v55 = vand.u32 7, %v653_v53 }
   0xe   : > { %s1187_s29 = sshll.u32 %s1654_s22, 3  ;;  %1268 = vmatprep.subr.bf16.mxu1 %v1407_v1  ;;  %vm1340_vm5 = vmpackc.low %vm859_vm4, %vm858_vm3  ;;  %vm860_vm6 = vcmp.eq.s32.totalorder %v684_v50, %v1577_v42  ;;  %vm861_vm7 = vcmp.eq.s32.totalorder %v691_v51, %v1577_v42  ;;  %v655_v57 = vadd.s32 56, %v1575_v41  ;;  %v712_v58 = vand.u32 7, %v654_v56 }
   0xf   : > { %s253_s10 = scalar_lea.vmem %s1646_s0, %s1187_s29  ;;  %1249 = vmatpush3.bf16.msra.mxu0 %v1377_v3  ;;  %vm1343_vm8 = vmpackc.low %vm861_vm7, %vm860_vm6  ;;  %vm862_vm9 = vcmp.eq.s32.totalorder %v698_v54, %v1577_v42  ;;  %vm863_vm10 = vcmp.eq.s32.totalorder %v705_v55, %v1577_v42  ;;  %v656_v60 = vadd.s32 64, %v1575_v41  ;;  %v657_v61 = vadd.s32 72, %v1575_v41  ;;  %s258_s17 = scalar_lea.vmem %s1651_s5, %s1187_s29 }
  0x10   : > { %v1192_v6 = vld [vmem:[%s253_s10] sm:$0xff]   ;;  %1250 = vmatprep.subr.bf16.mxu0 %v1407_v1  ;;  %vm1346_vm11 = vmpackc.low %vm863_vm10, %vm862_vm9  ;;  %v719_v59 = vand.u32 7, %v655_v57  ;;  %vm864_vm12 = vcmp.eq.s32.totalorder %v712_v58, %v1577_v42  ;;  %v658_v0 = vadd.s32 80, %v1575_v41  ;;  %v660_v4 = vadd.s32 96, %v1575_v41  ;;  %s1091_s29 = sshll.u32 %s1654_s22, 1 }
  0x11   : > { %v1193_v7 = vunpack.c.l.bf16 %v1192_v6  ;;  %v1194_v8 = vunpack.c.h.bf16 %v1192_v6  ;;  %1269 = vmatpush3.bf16.msra.mxu1 %v1386_v11  ;;  %v726_v62 = vand.u32 7, %v656_v60  ;;  %v733_v63 = vand.u32 7, %v657_v61  ;;  %s262_s20 = scalar_lea.vmem %s1652_s6, %s1091_s29 }
  0x12   : > { %1270 = vmatprep.subr.bf16.mxu1 %v1407_v1  ;;  %vm865_vm13 = vcmp.eq.s32.totalorder %v719_v59, %v1577_v42  ;;  %v740_v2 = vand.u32 7, %v658_v0  ;;  %v754_v6 = vand.u32 7, %v660_v4 }
  0x13   : > { %1251 = vmatpush3.bf16.msra.mxu0 %v1378_v5  ;;  %v275_v13 = vmul.f32 %v1193_v7, %v1092_v9  ;;  %v276_v14 = vmul.f32 %v1194_v8, %v1092_v9  ;;  %vm1349_vm14 = vmpackc.low %vm865_vm13, %vm864_vm12  ;;  %vm866_vm15 = vcmp.eq.s32.totalorder %v726_v62, %v1577_v42  ;;  %v661_v5 = vadd.s32 104, %v1575_v41 }
  0x14   : > { %1252 = vmatprep.subr.bf16.mxu0 %v1407_v1  ;;  %v662_v8 = vadd.s32 112, %v1575_v41  ;;  %v663_v9 = vadd.s32 120, %v1575_v41  ;;  %vm531_vm12 = vcmp.eq.s32.totalorder %v1575_v41, 0  ;;  %vm544_vm13 = vcmp.lt.s32.totalorder %v1575_v41, 7 }
  0x15   : > { %v284_v18 = vadd.f32 %v1093_v15, %v275_v13  ;;  %v285_v19 = vadd.f32 %v1093_v15, %v276_v14  ;;  %1271 = vmatpush3.bf16.msra.mxu1 %v1388_v16  ;;  %v761_v7 = vand.u32 7, %v661_v5 }
  0x16   : > { %1272 = vmatprep.subr.bf16.mxu1 %v1407_v1  ;;  %v768_v10 = vand.u32 7, %v662_v8  ;;  %v775_v11 = vand.u32 7, %v663_v9 }
  0x17   : > { %1253 = vmatpush3.bf16.msra.mxu0 %v1379_v12  ;;  %v295_v23 = vmul.f32 %v1094_v20, %v284_v18  ;;  %v296_v24 = vmul.f32 %v1094_v20, %v285_v19  ;;  %vm286_vm1 = vcmp.ge.f32.partialorder %v284_v18, 0.0  ;;  %vm287_vm2 = vcmp.ge.f32.partialorder %v285_v19, 0.0 }
  0x18   : > { %1254 = vmatprep.subr.bf16.mxu0 %v1407_v1  ;;  %vm871_vm6 = vcmp.eq.s32.totalorder %v761_v7, %v1577_v42  ;;  %vm873_vm9 = vcmp.eq.s32.totalorder %v775_v11, %v1577_v42 }
  0x19   : > { %1273 = vmatpush3.bf16.msra.mxu1 %v1390_v21  ;;  %v297_v27 = vsel %vm286_vm1, %v284_v18, %v295_v23  ;;  %v298_v28 = vsel %vm287_vm2, %v285_v19, %v296_v24  ;;  %vm868_vm2 = vcmp.eq.s32.totalorder %v740_v2, %v1577_v42 }
  0x1a   : > { %1274 = vmatprep.subr.bf16.mxu1 %v1407_v1  ;;  %v299_v29 = vpack.c.bf16 %v298_v28, %v297_v27 }
  0x1b   : > { %1255 = vmatpush3.bf16.msra.mxu0 %v1380_v17 }
  0x1c   : > { %1256 = vmatprep.subr.bf16.mxu0 %v1407_v1 }
  0x1d   : > { %1275 = vmatpush3.bf16.msra.mxu1 %v1392_v25 }
  0x1e   : > { %1276 = vmatprep.subr.bf16.mxu1 %v1407_v1 }
  0x1f   : > { %1257 = vmatpush3.bf16.msra.mxu0 %v1381_v22 }
  0x20   : > { %1258 = vmatprep.subr.bf16.mxu0 %v1407_v1 }
  0x21   : > { %1277 = vmatpush3.bf16.msra.mxu1 %v1394_v30 }
  0x22   : > { %1278 = vmatprep.subr.bf16.mxu1 %v1407_v1 }
  0x23   : > { %1259 = vmatpush3.bf16.msra.mxu0 %v1383_v26 }
  0x24   : > { %1284 = vmatprep.subr.bf16.mxu0 %v1407_v1 }
  0x25   : > { %1279 = vmatpush3.bf16.msra.mxu1 %v1396_v32 }
  0x26   : > { %1261 = vmatmul.mubr.bf16.vlgmr.msra.gmra.mrb[0].mxu0 %v299_v29  ;;  %1339 = vmatprep.subr.bf16.mxu1 %v1409_v43 }
  0x27   : > { %1285 = vmatpush3.bf16.msra.mxu0 %v1385_v31  ;;  %1300 = vmatprep.mubr.msk.bf16.mxu0 %vm1408_vm0, %v1407_v1 }
  0x28   : > { %1286 = vmatprep.subr.bf16.mxu0 %v1407_v1  ;;  %1281 = vmatmul.mubr.bf16.vlgmr.msra.gmra.mrb[0].mxu1 %v299_v29 }
  0x29   : > { %1336 = vmatprep.mubr.msk.f32.mxu1 %vm1408_vm0, %v1407_v1  ;;  %1341 = vmatpush3.bf16.msk.msra.mxu1 %vm1340_vm5, %v1410_v47  ;;  %vm867_vm0 = vcmp.eq.s32.totalorder %v733_v63, %v1577_v42  ;;  %vm870_vm5 = vcmp.eq.s32.totalorder %v754_v6, %v1577_v42 }
  0x2a   : > { %1342 = vmatprep.subr.bf16.mxu1 %v1409_v43  ;;  %vm1352_vm1 = vmpackc.low %vm867_vm0, %vm866_vm15  ;;  %vm922_vm15 = vcmask 1040384   ;;  %vm994_vm0 = vcmask 58368  }
  0x2b   : > { %1287 = vmatpush3.bf16.msra.mxu0 %v1387_v33  ;;  %vm1358_vm7 = vmpackc.low %vm871_vm6, %vm870_vm5 }
  0x2c   : > { %1288 = vmatprep.subr.bf16.mxu0 %v1407_v1 }
  0x2d   : > { %1344 = vmatpush3.bf16.msk.msra.mxu1 %vm1343_vm8, %v1410_v47  ;;  %vm872_vm8 = vcmp.eq.s32.totalorder %v768_v10, %v1577_v42 }
  0x2e   : > { %1345 = vmatprep.subr.bf16.mxu1 %v1409_v43  ;;  %vm1361_vm10 = vmpackc.low %vm873_vm9, %vm872_vm8 }
  0x2f   : > { %1289 = vmatpush3.bf16.msra.mxu0 %v1389_v34 }
  0x30   : > { %1290 = vmatprep.subr.bf16.mxu0 %v1407_v1 }
  0x31   : > { %1347 = vmatpush3.bf16.msk.msra.mxu1 %vm1346_vm11, %v1410_v47  ;;  %vm535_vm11 = vcmp.lt.s32.totalorder %v1575_v41, 1 }
  0x32   : > { %1348 = vmatprep.subr.bf16.mxu1 %v1409_v43 }
  0x33   : > { %1291 = vmatpush3.bf16.msra.mxu0 %v1391_v35 }
  0x34   : > { %1292 = vmatprep.subr.bf16.mxu0 %v1407_v1 }
  0x35   : > { %1350 = vmatpush3.bf16.msk.msra.mxu1 %vm1349_vm14, %v1410_v47  ;;  %vm541_vm14 = vcmp.eq.s32.totalorder %v1581_v44, 15 }
  0x36   : > { %1351 = vmatprep.subr.bf16.mxu1 %v1409_v43 }
  0x37   : > { %1293 = vmatpush3.bf16.msra.mxu0 %v1393_v36 }
  0x38   : > { %1294 = vmatprep.subr.bf16.mxu0 %v1407_v1 }
  0x39   : > { %1353 = vmatpush3.bf16.msk.msra.mxu1 %vm1352_vm1, %v1410_v47 }
  0x3a   : > { %1354 = vmatprep.subr.bf16.mxu1 %v1409_v43 }
  0x3b   : > { %1295 = vmatpush3.bf16.msra.mxu0 %v1395_v37 }
  0x3c   : > { %1296 = vmatprep.subr.bf16.mxu0 %v1407_v1 }
  0x3f   : > { %1297 = vmatpush3.bf16.msra.mxu0 %v1397_v38 }
  0x40   : > { %1298 = vmatprep.subr.bf16.mxu0 %v1407_v1  ;;  %v659_v1 = vadd.s32 88, %v1575_v41 }
  0x42   : > { %v747_v3 = vand.u32 7, %v659_v1 }
  0x43   : > { %1299 = vmatpush3.bf16.msra.mxu0 %v1398_v39 }
  0x44   : > { %vm869_vm3 = vcmp.eq.s32.totalorder %v747_v3, %v1577_v42 }
  0x45   : > { %vm1355_vm4 = vmpackc.low %vm869_vm3, %vm868_vm2 }
  0x46   : > { %1301 = vmatmul.mubr.bf16.vlgmr.msra.gmra.mrb[4].mxu0 %v299_v29  ;;  %1356 = vmatpush3.bf16.msk.msra.mxu1 %vm1355_vm4, %v1410_v47 }
  0x47   : > { %1357 = vmatprep.subr.bf16.mxu1 %v1409_v43 }
  0x4a   : > { %1359 = vmatpush3.bf16.msk.msra.mxu1 %vm1358_vm7, %v1410_v47 }
  0x4b   : > { %1360 = vmatprep.subr.bf16.mxu1 %v1409_v43 }
  0x4e   : > { %1362 = vmatpush3.bf16.msk.msra.mxu1 %vm1361_vm10, %v1410_v47 }
  0xf9   : > { %v398_v12 = vpop.f32.mrb[0].mxu0 }
  0xfa   : > { %v533_v13 = vrot.slane %v398_v12, 7  ;;  %v1262_v14 = vpop.f32.mrb[1].mxu0 }
  0xfb   : > { %v401_v15 = vpop.f32.mrb[2].mxu0  ;;  %v521_v21 = vpop.f32.mrb[0].mxu1 }
  0xfc   : > { %v534_v16 = vrot.slane %v401_v15, 7  ;;  %v1263_v17 = vpop.f32.mrb[3].mxu0  ;;  %v542_v22 = vrot.slane %v521_v21, 1  ;;  %v1282_v23 = vpop.f32.mrb[1].mxu1 }
  0xfd   : > { %v524_v24 = vpop.f32.mrb[2].mxu1 }
  0xfe   : > { %v537_v18 = vsel %vm535_vm11, %v534_v16, %v533_v13  ;;  %v536_v19 = vsel %vm535_vm11, %v533_v13, %v534_v16  ;;  %v543_v25 = vrot.slane %v524_v24, 1  ;;  %v1283_v26 = vpop.f32.mrb[3].mxu1 }
  0xff   : > { %v538_v20 = vsel %vm531_vm12, 0.0, %v537_v18 }
 0x100   : > { %v545_v27 = vsel %vm544_vm13, %v542_v22, %v543_v25  ;;  %v546_v28 = vsel %vm544_vm13, %v543_v25, %v542_v22 }
 0x101   : > { %v548_v29 = vsel %vm541_vm14, 0.0, %v546_v28 }
 0x119   : > { %v631_v30 = vpop.f32.mrb[4].mxu0 }
 0x11a   : > { %v632_v31 = vadd.f32 %v631_v30, %v538_v20  ;;  %v1302_v32 = vpop.f32.mrb[5].mxu0 }
 0x11b   : > { %v634_v33 = vpop.f32.mrb[6].mxu0 }
 0x11c   : > { %v638_v34 = vadd.f32 %v632_v31, %v545_v27  ;;  %v635_v35 = vadd.f32 %v634_v33, %v536_v19  ;;  %v1303_v36 = vpop.f32.mrb[7].mxu0 }
 0x11e   : > { %v639_v37 = vadd.f32 %v635_v35, %v548_v29  ;;  %v913_v38 = vmul.f32 %v638_v34, %v638_v34 }
 0x120   : > { %v1198_v39 = vpack.c.bf16 %v639_v37, %v638_v34  ;;  %v906_v40 = vadd.f32 %v639_v37, %v638_v34  ;;  %v914_v41 = vmul.f32 %v639_v37, %v639_v37 }
 0x122   : > { %1199 = vst [vmem:[%s258_s17] sm:$0xff] %v1198_v39   ;;  %v907_v42 = vrot.slane %v906_v40, 4  ;;  %v915_v43 = vadd.f32 %v914_v41, %v913_v38 }
 0x124   : > { %v908_v44 = vadd.f32 %v907_v42, %v906_v40  ;;  %v916_v45 = vrot.slane %v915_v43, 4 }
 0x126   : > { %v909_v46 = vrot.slane %v908_v44, 2  ;;  %v917_v47 = vadd.f32 %v916_v45, %v915_v43 }
 0x128   : > { %v910_v48 = vadd.f32 %v909_v46, %v908_v44  ;;  %v918_v49 = vrot.slane %v917_v47, 2 }
 0x12a   : > { %v911_v50 = vrot.slane %v910_v48, 1  ;;  %v919_v51 = vadd.f32 %v918_v49, %v917_v47 }
 0x12c   : > { %v920_v52 = vrot.slane %v919_v51, 1  ;;  %v912_v53 = vadd.f32 %v911_v50, %v910_v48 }
 0x12e   : > { %v921_v54 = vadd.f32 %v920_v52, %v919_v51 }
 0x130   : > { %v923_v55 = vsel %vm922_vm15, %v912_v53, %v921_v54 }
 0x131   : > { %1337 = vmatmul.mubr.f32.vlgmr.msra.gmra.mrb[4].mxu1 %v923_v55 }
 0x204   : > { %v990_v56 = vpop.f32.mrb[4].mxu1 }
 0x205   : > { %995 = vst.msk [vmem:[%s262_s20] sm:$0x3] %vm994_vm0, %v990_v56  ;;  %v1338_v57 = vpop.f32.mrb[5].mxu1 }
 0x206 PF: > { %s17_s21 = sadd.s32 1, %s1405_s21  }
 0x207   : > { %p14_p4 = scmp.ge.s32.totalorder %s17_s21, 4  }
 0x209   :  { %16 = sbr.rel (!%p14_p4) target bundleno = 1 (0x1), region = 84 }

// kernel: double_conv.3
= control target key start
LH: loop header
LB: loop body
LE: loop exit
PB: predicated region body
PF: predicated region fallthrough
CT: control target
= control target key end

     0   :  { %s1151_s12 = smov 0   ;;  %s1273_s0 = inlined_call_operand.vmem [shape: bf16[2,16,64], index: 0, kind: input, shape index: {}]   ;;  %s1274_s1 = inlined_call_operand.vmem [shape: bf16[3,64,128], index: 1, kind: input, shape index: {}]   ;;  %s1275_s2 = inlined_call_operand.vmem [shape: bf16[2,16,128], index: 2, kind: output, shape index: {0}]   ;;  %s1276_s3 = inlined_call_operand.vmem [shape: f32[2,2,8], index: 3, kind: output, shape index: {1}]  }
   0x1 LB: > { %s880_s13 = sadd.s32 4294967295, %s1125_s12   ;;  %p884_p0 = scmp.ge.s32.totalorder %s1125_s12, 1  ;;  %s1125_s12 = sphi %s1151_s12, %s14_s12  }
   0x2   : > { %p140_p1 = scmp.lt.s32.totalorder %s1125_s12, 3 }
   0x4   : > { %p141_p2 = pnand %p884_p0, %p140_p1 }
   0x5   : > { %v1106_v0 = vld [vmem:[%s1274_s1] sm:$0xff] (!%p141_p2)   ;;  %v1127_v1 = vmov (!%p141_p2), 0.0   ;;  %v1107_v2 = vld [vmem:[%s1274_s1 + $0x8] sm:$0xff] (!%p141_p2)   ;;  %vm1128_vm0 = vmmov (!%p141_p2), 0   ;;  %p168_p3 = scmp.lt.s32.totalorder (!%p141_p2), %s880_s13, 1  ;;  %v1108_v5 = vld [vmem:[%s1274_s1 + $0x10] sm:$0xff] (!%p141_p2)   ;;  %v350_v14 = vlaneseq (!%p141_p2) }
   0x6   : > { %144 = sbr.rel (%p141_p2) target bundleno = 486 (0x1e6), region = 28  ;;  %999 = vmatprep.subr.bf16.mxu0 (!%p141_p2), %v1127_v1  ;;  %1011 = vmatprep.subr.bf16.mxu1 (!%p141_p2), %v1127_v1  ;;  %v1109_v3 = vld [vmem:[%s1274_s1 + $0x40] sm:$0xff] (!%p141_p2)   ;;  %v1112_v4 = vld [vmem:[%s1274_s1 + $0x48] sm:$0xff] (!%p141_p2)   ;;  %v1114_v6 = vld [vmem:[%s1274_s1 + $0x50] sm:$0xff] (!%p141_p2)   ;;  %vm222_vm1 = vcmask (!%p141_p2), 523264   ;;  %v1129_v19 = vmov (!%p141_p2), 0.0|0.0  }
   0x7   : > { %1000 = vmatpush3.bf16.msra.mxu0 (!%p141_p2), %v1106_v0  ;;  %1007 = vmatprep.mubr.msk.bf16.mxu0 (!%p141_p2), %vm1128_vm0, %v1127_v1  ;;  %v1110_v7 = vld [vmem:[%s1274_s1 + $0x18] sm:$0xff] (!%p141_p2)   ;;  %v1113_v10 = vld [vmem:[%s1274_s1 + $0x20] sm:$0xff] (!%p141_p2)   ;;  %v1115_v11 = vld [vmem:[%s1274_s1 + $0x28] sm:$0xff] (!%p141_p2)   ;;  %v1210_v15 = vshrl.u32 (!%p141_p2), %v350_v14, 7  ;;  %v1215_v17 = vand.u32 (!%p141_p2), 127, %v350_v14 }
   0x8   : > { %1001 = vmatprep.subr.bf16.mxu0 (!%p141_p2), %v1127_v1  ;;  %1019 = vmatprep.mubr.msk.bf16.mxu1 (!%p141_p2), %vm1128_vm0, %v1127_v1  ;;  %v1116_v9 = vld [vmem:[%s1274_s1 + $0x58] sm:$0xff] (!%p141_p2)   ;;  %v1117_v12 = vld [vmem:[%s1274_s1 + $0x30] sm:$0xff] (!%p141_p2)   ;;  %v1130_v25 = vmov (!%p141_p2), 1.0|1.0  }
   0x9   : > { %1012 = vmatpush3.bf16.msra.mxu1 (!%p141_p2), %v1109_v3  ;;  %v1118_v13 = vld [vmem:[%s1274_s1 + $0x38] sm:$0xff] (!%p141_p2)   ;;  %v1213_v16 = vadd.s32 (!%p141_p2), 8, %v1210_v15  ;;  %v468_v18 = vand.u32 (!%p141_p2), 7, %v1210_v15  ;;  %v448_v21 = vadd.s32 (!%p141_p2), 16, %v1210_v15  ;;  %v449_v22 = vadd.s32 (!%p141_p2), 24, %v1210_v15 }
   0xa   : > { %1013 = vmatprep.subr.bf16.mxu1 (!%p141_p2), %v1127_v1  ;;  %v450_v26 = vadd.s32 (!%p141_p2), 32, %v1210_v15  ;;  %v451_v27 = vadd.s32 (!%p141_p2), 40, %v1210_v15  ;;  %v452_v30 = vadd.s32 (!%p141_p2), 48, %v1210_v15  ;;  %v453_v31 = vadd.s32 (!%p141_p2), 56, %v1210_v15 }
   0xb   : > { %1002 = vmatpush3.bf16.msra.mxu0 (!%p141_p2), %v1107_v2  ;;  %v475_v20 = vand.u32 (!%p141_p2), 7, %v1213_v16  ;;  %vm656_vm2 = vcmp.eq.s32.totalorder (!%p141_p2), %v468_v18, %v1215_v17  ;;  %v482_v23 = vand.u32 (!%p141_p2), 7, %v448_v21  ;;  %v489_v24 = vand.u32 (!%p141_p2), 7, %v449_v22 }
   0xc   : > { %1003 = vmatprep.subr.bf16.mxu0 (!%p141_p2), %v1127_v1  ;;  %v496_v28 = vand.u32 (!%p141_p2), 7, %v450_v26  ;;  %v503_v29 = vand.u32 (!%p141_p2), 7, %v451_v27  ;;  %v510_v32 = vand.u32 (!%p141_p2), 7, %v452_v30  ;;  %v517_v33 = vand.u32 (!%p141_p2), 7, %v453_v31 }
   0xd   : > { %s1278_s13 = smov (!%p168_p3, %s880_s13), 1  ;;  %1014 = vmatpush3.bf16.msra.mxu1 %v1112_v4  ;;  %vm657_vm3 = vcmp.eq.s32.totalorder %v475_v20, %v1215_v17  ;;  %vm658_vm5 = vcmp.eq.s32.totalorder %v482_v23, %v1215_v17  ;;  %vm659_vm6 = vcmp.eq.s32.totalorder %v489_v24, %v1215_v17  ;;  %v454_v34 = vadd.s32 64, %v1210_v15 }
   0xe   : > { %s958_s24 = sshll.u32 %s1278_s13, 3  ;;  %1015 = vmatprep.subr.bf16.mxu1 %v1127_v1  ;;  %vm1071_vm4 = vmpackc.low %vm657_vm3, %vm656_vm2  ;;  %vm660_vm8 = vcmp.eq.s32.totalorder %v496_v28, %v1215_v17  ;;  %vm661_vm9 = vcmp.eq.s32.totalorder %v503_v29, %v1215_v17  ;;  %vm662_vm11 = vcmp.eq.s32.totalorder %v510_v32, %v1215_v17  ;;  %vm663_vm12 = vcmp.eq.s32.totalorder %v517_v33, %v1215_v17  ;;  %s889_s20 = sshll.u32 %s1278_s13, 1 }
   0xf   : > { %s172_s27 = scalar_lea.vmem %s1273_s0, %s958_s24  ;;  %1004 = vmatpush3.bf16.msra.mxu0 %v1108_v5  ;;  %vm1074_vm7 = vmpackc.low %vm659_vm6, %vm658_vm5  ;;  %v455_v35 = vadd.s32 72, %v1210_v15  ;;  %v524_v36 = vand.u32 7, %v454_v34  ;;  %v456_v38 = vadd.s32 80, %v1210_v15  ;;  %v457_v39 = vadd.s32 88, %v1210_v15  ;;  %s177_s19 = scalar_lea.vmem %s1275_s2, %s958_s24 }
  0x10   : > { %1005 = vmatprep.subr.bf16.mxu0 %v1127_v1  ;;  %v1111_v8 = vld [vmem:[%s172_s27] sm:$0xff]   ;;  %vm1077_vm10 = vmpackc.low %vm661_vm9, %vm660_vm8  ;;  %v458_v42 = vadd.s32 96, %v1210_v15  ;;  %v459_v43 = vadd.s32 104, %v1210_v15  ;;  %v460_v46 = vadd.s32 112, %v1210_v15  ;;  %v461_v47 = vadd.s32 120, %v1210_v15  ;;  %s181_s23 = scalar_lea.vmem %s1276_s3, %s889_s20 }
  0x11   : > { %1016 = vmatpush3.bf16.msra.mxu1 %v1114_v6  ;;  %vm1080_vm13 = vmpackc.low %vm663_vm12, %vm662_vm11  ;;  %v531_v37 = vand.u32 7, %v455_v35  ;;  %vm664_vm14 = vcmp.eq.s32.totalorder %v524_v36, %v1215_v17  ;;  %v538_v40 = vand.u32 7, %v456_v38  ;;  %v545_v41 = vand.u32 7, %v457_v39 }
  0x12   : > { %1017 = vmatprep.subr.bf16.mxu1 %v1127_v1  ;;  %v552_v44 = vand.u32 7, %v458_v42  ;;  %v559_v45 = vand.u32 7, %v459_v43  ;;  %v566_v48 = vand.u32 7, %v460_v46  ;;  %v573_v49 = vand.u32 7, %v461_v47 }
  0x13   : > { %1006 = vmatpush3.bf16.msra.mxu0 %v1110_v7  ;;  %vm665_vm15 = vcmp.eq.s32.totalorder %v531_v37, %v1215_v17  ;;  %vm667_vm2 = vcmp.eq.s32.totalorder %v545_v41, %v1215_v17  ;;  %vm353_vm11 = vcmp.eq.s32.totalorder %v1210_v15, 0  ;;  %vm366_vm12 = vcmp.lt.s32.totalorder %v1210_v15, 7 }
  0x14   : > { %1023 = vmatprep.subr.bf16.mxu0 %v1127_v1  ;;  %vm669_vm5 = vcmp.eq.s32.totalorder %v559_v45, %v1215_v17  ;;  %vm671_vm8 = vcmp.eq.s32.totalorder %v573_v49, %v1215_v17 }
  0x15   : > { %1018 = vmatpush3.bf16.msra.mxu1 %v1116_v9 }
  0x16   : > { %1008 = vmatmul.mubr.msk.bf16.vlgmr.msra.gmra.mrb[0].mxu0 %vm222_vm1, %v1111_v8  ;;  %1070 = vmatprep.subr.bf16.mxu1 %v1129_v19 }
  0x17   : > { %1024 = vmatpush3.bf16.msra.mxu0 %v1113_v10  ;;  %1031 = vmatprep.mubr.msk.bf16.mxu0 %vm1128_vm0, %v1127_v1 }
  0x18   : > { %1025 = vmatprep.subr.bf16.mxu0 %v1127_v1  ;;  %1020 = vmatmul.mubr.msk.bf16.vlgmr.msra.gmra.mrb[0].mxu1 %vm222_vm1, %v1111_v8 }
  0x19   : > { %1067 = vmatprep.mubr.msk.f32.mxu1 %vm1128_vm0, %v1127_v1  ;;  %1072 = vmatpush3.bf16.msk.msra.mxu1 %vm1071_vm4, %v1130_v25  ;;  %vm1083_vm0 = vmpackc.low %vm665_vm15, %vm664_vm14  ;;  %vm668_vm4 = vcmp.eq.s32.totalorder %v552_v44, %v1215_v17  ;;  %vm720_vm14 = vcmask 1040384   ;;  %vm792_vm15 = vcmask 58368  }
  0x1a   : > { %1073 = vmatprep.subr.bf16.mxu1 %v1129_v19  ;;  %vm1089_vm6 = vmpackc.low %vm669_vm5, %vm668_vm4 }
  0x1b   : > { %1026 = vmatpush3.bf16.msra.mxu0 %v1115_v11 }
  0x1c   : > { %1027 = vmatprep.subr.bf16.mxu0 %v1127_v1 }
  0x1d   : > { %1075 = vmatpush3.bf16.msk.msra.mxu1 %vm1074_vm7, %v1130_v25  ;;  %vm670_vm7 = vcmp.eq.s32.totalorder %v566_v48, %v1215_v17 }
  0x1e   : > { %1076 = vmatprep.subr.bf16.mxu1 %v1129_v19  ;;  %vm1092_vm9 = vmpackc.low %vm671_vm8, %vm670_vm7 }
  0x1f   : > { %1028 = vmatpush3.bf16.msra.mxu0 %v1117_v12 }
  0x20   : > { %1029 = vmatprep.subr.bf16.mxu0 %v1127_v1 }
  0x21   : > { %1078 = vmatpush3.bf16.msk.msra.mxu1 %vm1077_vm10, %v1130_v25  ;;  %vm357_vm10 = vcmp.lt.s32.totalorder %v1210_v15, 1 }
  0x22   : > { %1079 = vmatprep.subr.bf16.mxu1 %v1129_v19 }
  0x23   : > { %1030 = vmatpush3.bf16.msra.mxu0 %v1118_v13 }
  0x25   : > { %1081 = vmatpush3.bf16.msk.msra.mxu1 %vm1080_vm13, %v1130_v25  ;;  %vm363_vm13 = vcmp.eq.s32.totalorder %v1213_v16, 15 }
  0x26   : > { %1032 = vmatmul.mubr.msk.bf16.vlgmr.msra.gmra.mrb[4].mxu0 %vm222_vm1, %v1111_v8  ;;  %1082 = vmatprep.subr.bf16.mxu1 %v1129_v19  ;;  %vm666_vm1 = vcmp.eq.s32.totalorder %v538_v40, %v1215_v17 }
  0x27   : > { %vm1086_vm3 = vmpackc.low %vm667_vm2, %vm666_vm1 }
  0x29   : > { %1084 = vmatpush3.bf16.msk.msra.mxu1 %vm1083_vm0, %v1130_v25 }
  0x2a   : > { %1085 = vmatprep.subr.bf16.mxu1 %v1129_v19 }
  0x2d   : > { %1087 = vmatpush3.bf16.msk.msra.mxu1 %vm1086_vm3, %v1130_v25 }
  0x2e   : > { %1088 = vmatprep.subr.bf16.mxu1 %v1129_v19 }
  0x31   : > { %1090 = vmatpush3.bf16.msk.msra.mxu1 %vm1089_vm6, %v1130_v25 }
  0x32   : > { %1091 = vmatprep.subr.bf16.mxu1 %v1129_v19 }
  0x35   : > { %1093 = vmatpush3.bf16.msk.msra.mxu1 %vm1092_vm9, %v1130_v25 }
  0xe9   : > { %v260_v50 = vpop.f32.mrb[0].mxu0 }
  0xea   : > { %v355_v51 = vrot.slane %v260_v50, 7  ;;  %v1009_v52 = vpop.f32.mrb[1].mxu0 }
  0xeb   : > { %v263_v53 = vpop.f32.mrb[2].mxu0  ;;  %v343_v56 = vpop.f32.mrb[0].mxu1 }
  0xec   : > { %v356_v54 = vrot.slane %v263_v53, 7  ;;  %v1010_v55 = vpop.f32.mrb[3].mxu0  ;;  %v364_v57 = vrot.slane %v343_v56, 1  ;;  %v1021_v58 = vpop.f32.mrb[1].mxu1 }
  0xed   : > { %v346_v59 = vpop.f32.mrb[2].mxu1 }
  0xee   : > { %v359_v60 = vsel %vm357_vm10, %v356_v54, %v355_v51  ;;  %v358_v61 = vsel %vm357_vm10, %v355_v51, %v356_v54  ;;  %v365_v62 = vrot.slane %v346_v59, 1  ;;  %v1022_v63 = vpop.f32.mrb[3].mxu1 }
  0xef   : > { %v360_v0 = vsel %vm353_vm11, 0.0, %v359_v60 }
  0xf0   : > { %v367_v1 = vsel %vm366_vm12, %v364_v57, %v365_v62  ;;  %v368_v2 = vsel %vm366_vm12, %v365_v62, %v364_v57 }
  0xf1   : > { %v370_v3 = vsel %vm363_vm13, 0.0, %v368_v2 }
  0xf9   : > { %v429_v4 = vpop.f32.mrb[4].mxu0 }
  0xfa   : > { %v430_v5 = vadd.f32 %v429_v4, %v360_v0  ;;  %v1033_v6 = vpop.f32.mrb[5].mxu0 }
  0xfb   : > { %v432_v7 = vpop.f32.mrb[6].mxu0 }
  0xfc   : > { %v436_v8 = vadd.f32 %v430_v5, %v367_v1  ;;  %v433_v9 = vadd.f32 %v432_v7, %v358_v61  ;;  %v1034_v10 = vpop.f32.mrb[7].mxu0 }
  0xfe   : > { %v437_v11 = vadd.f32 %v433_v9, %v370_v3  ;;  %v711_v12 = vmul.f32 %v436_v8, %v436_v8 }
 0x100   : > { %v965_v13 = vpack.c.bf16 %v437_v11, %v436_v8  ;;  %v704_v14 = vadd.f32 %v437_v11, %v436_v8  ;;  %v712_v15 = vmul.f32 %v437_v11, %v437_v11 }
 0x102   : > { %966 = vst [vmem:[%s177_s19] sm:$0xff] %v965_v13   ;;  %v705_v16 = vrot.slane %v704_v14, 4  ;;  %v713_v17 = vadd.f32 %v712_v15, %v711_v12 }
 0x104   : > { %v706_v18 = vadd.f32 %v705_v16, %v704_v14  ;;  %v714_v19 = vrot.slane %v713_v17, 4 }
 0x106   : > { %v707_v20 = vrot.slane %v706_v18, 2  ;;  %v715_v21 = vadd.f32 %v714_v19, %v713_v17 }
 0x108   : > { %v708_v22 = vadd.f32 %v707_v20, %v706_v18  ;;  %v716_v23 = vrot.slane %v715_v21, 2 }
 0x10a   : > { %v709_v24 = vrot.slane %v708_v22, 1  ;;  %v717_v25 = vadd.f32 %v716_v23, %v715_v21 }
 0x10c   : > { %v718_v26 = vrot.slane %v717_v25, 1  ;;  %v710_v27 = vadd.f32 %v709_v24, %v708_v22 }
 0x10e   : > { %v719_v28 = vadd.f32 %v718_v26, %v717_v25 }
 0x110   : > { %v721_v29 = vsel %vm720_vm14, %v710_v27, %v719_v28 }
 0x111   : > { %1068 = vmatmul.mubr.f32.vlgmr.msra.gmra.mrb[4].mxu1 %v721_v29 }
 0x1e4   : > { %v788_v30 = vpop.f32.mrb[4].mxu1 }
 0x1e5   : > { %793 = vst.msk [vmem:[%s181_s23] sm:$0x3] %vm792_vm15, %v788_v30  ;;  %v1069_v31 = vpop.f32.mrb[5].mxu1 }
 0x1e6 PF: > { %s14_s12 = sadd.s32 1, %s1125_s12  }
 0x1e7   : > { %p11_p4 = scmp.ge.s32.totalorder %s14_s12, 4  }
 0x1e9   :  { %13 = sbr.rel (!%p11_p4) target bundleno = 1 (0x1), region = 72 }

// kernel: double_conv.4
= control target key start
LH: loop header
LB: loop body
LE: loop exit
PB: predicated region body
PF: predicated region fallthrough
CT: control target
= control target key end

     0   :  { %s1446_s21 = smov 0   ;;  %s1646_s0 = inlined_call_operand.vmem [shape: bf16[2,16,128], index: 0, kind: input, shape index: {}]   ;;  %s1647_s1 = inlined_call_operand.vmem [shape: f32[1,128], index: 1, kind: input, shape index: {}]   ;;  %s1648_s2 = inlined_call_operand.vmem [shape: f32[1,128], index: 2, kind: input, shape index: {}]   ;;  %s1649_s3 = inlined_call_operand.vmem [shape: f32[1,128], index: 3, kind: input, shape index: {}]   ;;  %s1650_s4 = inlined_call_operand.vmem [shape: bf16[3,128,128], index: 4, kind: input, shape index: {}]   ;;  %s1651_s5 = inlined_call_operand.vmem [shape: bf16[2,16,128], index: 5, kind: output, shape index: {0}]   ;;  %s1652_s6 = inlined_call_operand.vmem [shape: f32[2,2,8], index: 6, kind: output, shape index: {1}]  }
   0x1 LB: > { %s1082_s22 = sadd.s32 4294967295, %s1405_s21   ;;  %p1086_p0 = scmp.ge.s32.totalorder %s1405_s21, 1  ;;  %s1405_s21 = sphi %s1446_s21, %s17_s21  }
   0x2   : > { %p215_p1 = scmp.lt.s32.totalorder %s1405_s21, 3 }
   0x4   : > { %p216_p2 = pnand %p1086_p0, %p215_p1 }
   0x5   : > { %v1375_v0 = vld [vmem:[%s1650_s4] sm:$0xff] (!%p216_p2)   ;;  %v1407_v1 = vmov (!%p216_p2), 0.0   ;;  %v1376_v2 = vld [vmem:[%s1650_s4 + $0x8] sm:$0xff] (!%p216_p2)   ;;  %vm1408_vm0 = vmmov (!%p216_p2), 0   ;;  %p249_p3 = scmp.lt.s32.totalorder (!%p216_p2), %s1082_s22, 1  ;;  %v1377_v3 = vld [vmem:[%s1650_s4 + $0x10] sm:$0xff] (!%p216_p2)   ;;  %v528_v40 = vlaneseq (!%p216_p2) }
   0x6   : > { %219 = sbr.rel (%p216_p2) target bundleno = 518 (0x206), region = 40  ;;  %1244 = vmatprep.subr.bf16.mxu0 (!%p216_p2), %v1407_v1  ;;  %1264 = vmatprep.subr.bf16.mxu1 (!%p216_p2), %v1407_v1  ;;  %v1382_v4 = vld [vmem:[%s1650_s4 + $0x80] sm:$0xff] (!%p216_p2)   ;;  %v1378_v5 = vld [vmem:[%s1650_s4 + $0x18] sm:$0xff] (!%p216_p2)   ;;  %v1384_v10 = vld [vmem:[%s1650_s4 + $0x88] sm:$0xff] (!%p216_p2)   ;;  %v1409_v43 = vmov (!%p216_p2), 0.0|0.0  }
   0x7   : > { %1245 = vmatpush3.bf16.msra.mxu0 (!%p216_p2), %v1375_v0  ;;  %1260 = vmatprep.mubr.msk.bf16.mxu0 (!%p216_p2), %vm1408_vm0, %v1407_v1  ;;  %v1092_v9 = vld [vmem:[%s1647_s1] ss:$0 sm:$0xff] (!%p216_p2)  ;;  %v1386_v11 = vld [vmem:[%s1650_s4 + $0x90] sm:$0xff] (!%p216_p2)   ;;  %v1388_v16 = vld [vmem:[%s1650_s4 + $0x98] sm:$0xff] (!%p216_p2)   ;;  %v1575_v41 = vshrl.u32 (!%p216_p2), %v528_v40, 7  ;;  %v1577_v42 = vand.u32 (!%p216_p2), 127, %v528_v40 }
   0x8   : > { %1246 = vmatprep.subr.bf16.mxu0 (!%p216_p2), %v1407_v1  ;;  %1280 = vmatprep.mubr.msk.bf16.mxu1 (!%p216_p2), %vm1408_vm0, %v1407_v1  ;;  %v1379_v12 = vld [vmem:[%s1650_s4 + $0x20] sm:$0xff] (!%p216_p2)   ;;  %v1380_v17 = vld [vmem:[%s1650_s4 + $0x28] sm:$0xff] (!%p216_p2)   ;;  %v1381_v22 = vld [vmem:[%s1650_s4 + $0x30] sm:$0xff] (!%p216_p2)   ;;  %v1410_v47 = vmov (!%p216_p2), 1.0|1.0  }
   0x9   : > { %1265 = vmatpush3.bf16.msra.mxu1 (!%p216_p2), %v1382_v4  ;;  %v1093_v15 = vld [vmem:[%s1648_s2] ss:$0 sm:$0xff] (!%p216_p2)  ;;  %v1392_v25 = vld [vmem:[%s1650_s4 + $0xa8] sm:$0xff] (!%p216_p2)   ;;  %v1383_v26 = vld [vmem:[%s1650_s4 + $0x38] sm:$0xff] (!%p216_p2)   ;;  %v1581_v44 = vadd.s32 (!%p216_p2), 8, %v1575_v41  ;;  %v670_v45 = vand.u32 (!%p216_p2), 7, %v1575_v41 }
   0xa   : > { %1266 = vmatprep.subr.bf16.mxu1 (!%p216_p2), %v1407_v1  ;;  %v1094_v20 = vld [vmem:[%s1649_s3] ss:$0 sm:$0xff] (!%p216_p2)  ;;  %v1394_v30 = vld [vmem:[%s1650_s4 + $0xb0] sm:$0xff] (!%p216_p2)   ;;  %v1396_v32 = vld [vmem:[%s1650_s4 + $0xb8] sm:$0xff] (!%p216_p2)   ;;  %v650_v48 = vadd.s32 (!%p216_p2), 16, %v1575_v41  ;;  %v651_v49 = vadd.s32 (!%p216_p2), 24, %v1575_v41 }
   0xb   : > { %1247 = vmatpush3.bf16.msra.mxu0 (!%p216_p2), %v1376_v2  ;;  %v1390_v21 = vld [vmem:[%s1650_s4 + $0xa0] sm:$0xff] (!%p216_p2)   ;;  %v1387_v33 = vld [vmem:[%s1650_s4 + $0x48] sm:$0xff] (!%p216_p2)   ;;  %v1389_v34 = vld [vmem:[%s1650_s4 + $0x50] sm:$0xff] (!%p216_p2)   ;;  %v677_v46 = vand.u32 (!%p216_p2), 7, %v1581_v44  ;;  %vm858_vm3 = vcmp.eq.s32.totalorder (!%p216_p2), %v670_v45, %v1577_v42  ;;  %v652_v52 = vadd.s32 (!%p216_p2), 32, %v1575_v41  ;;  %v653_v53 = vadd.s32 (!%p216_p2), 40, %v1575_v41 }
   0xc   : > { %1248 = vmatprep.subr.bf16.mxu0 (!%p216_p2), %v1407_v1  ;;  %v1385_v31 = vld [vmem:[%s1650_s4 + $0x40] sm:$0xff] (!%p216_p2)   ;;  %v1391_v35 = vld [vmem:[%s1650_s4 + $0x58] sm:$0xff] (!%p216_p2)   ;;  %v1395_v37 = vld [vmem:[%s1650_s4 + $0x68] sm:$0xff] (!%p216_p2)   ;;  %v684_v50 = vand.u32 (!%p216_p2), 7, %v650_v48  ;;  %v691_v51 = vand.u32 (!%p216_p2), 7, %v651_v49  ;;  %v654_v56 = vadd.s32 (!%p216_p2), 48, %v1575_v41 }
   0xd   : > { %s1654_s22 = smov (!%p249_p3, %s1082_s22), 1  ;;  %1267 = vmatpush3.bf16.msra.mxu1 %v1384_v10  ;;  %v1393_v36 = vld [vmem:[%s1650_s4 + $0x60] sm:$0xff]   ;;  %v1397_v38 = vld [vmem:[%s1650_s4 + $0x70] sm:$0xff]   ;;  %v1398_v39 = vld [vmem:[%s1650_s4 + $0x78] sm:$0xff]   ;;  %vm859_vm4 = vcmp.eq.s32.totalorder %v677_v46, %v1577_v42  ;;  %v698_v54 = vand.u32 7, %v652_v52  ;;  %v705_v55 = vand.u32 7, %v653_v53 }
   0xe   : > { %s1187_s29 = sshll.u32 %s1654_s22, 3  ;;  %1268 = vmatprep.subr.bf16.mxu1 %v1407_v1  ;;  %vm1340_vm5 = vmpackc.low %vm859_vm4, %vm858_vm3  ;;  %vm860_vm6 = vcmp.eq.s32.totalorder %v684_v50, %v1577_v42  ;;  %vm861_vm7 = vcmp.eq.s32.totalorder %v691_v51, %v1577_v42  ;;  %v655_v57 = vadd.s32 56, %v1575_v41  ;;  %v712_v58 = vand.u32 7, %v654_v56 }
   0xf   : > { %s253_s10 = scalar_lea.vmem %s1646_s0, %s1187_s29  ;;  %1249 = vmatpush3.bf16.msra.mxu0 %v1377_v3  ;;  %vm1343_vm8 = vmpackc.low %vm861_vm7, %vm860_vm6  ;;  %vm862_vm9 = vcmp.eq.s32.totalorder %v698_v54, %v1577_v42  ;;  %vm863_vm10 = vcmp.eq.s32.totalorder %v705_v55, %v1577_v42  ;;  %v656_v60 = vadd.s32 64, %v1575_v41  ;;  %v657_v61 = vadd.s32 72, %v1575_v41  ;;  %s258_s17 = scalar_lea.vmem %s1651_s5, %s1187_s29 }
  0x10   : > { %v1192_v6 = vld [vmem:[%s253_s10] sm:$0xff]   ;;  %1250 = vmatprep.subr.bf16.mxu0 %v1407_v1  ;;  %vm1346_vm11 = vmpackc.low %vm863_vm10, %vm862_vm9  ;;  %v719_v59 = vand.u32 7, %v655_v57  ;;  %vm864_vm12 = vcmp.eq.s32.totalorder %v712_v58, %v1577_v42  ;;  %v658_v0 = vadd.s32 80, %v1575_v41  ;;  %v660_v4 = vadd.s32 96, %v1575_v41  ;;  %s1091_s29 = sshll.u32 %s1654_s22, 1 }
  0x11   : > { %v1193_v7 = vunpack.c.l.bf16 %v1192_v6  ;;  %v1194_v8 = vunpack.c.h.bf16 %v1192_v6  ;;  %1269 = vmatpush3.bf16.msra.mxu1 %v1386_v11  ;;  %v726_v62 = vand.u32 7, %v656_v60  ;;  %v733_v63 = vand.u32 7, %v657_v61  ;;  %s262_s20 = scalar_lea.vmem %s1652_s6, %s1091_s29 }
  0x12   : > { %1270 = vmatprep.subr.bf16.mxu1 %v1407_v1  ;;  %vm865_vm13 = vcmp.eq.s32.totalorder %v719_v59, %v1577_v42  ;;  %v740_v2 = vand.u32 7, %v658_v0  ;;  %v754_v6 = vand.u32 7, %v660_v4 }
  0x13   : > { %1251 = vmatpush3.bf16.msra.mxu0 %v1378_v5  ;;  %v275_v13 = vmul.f32 %v1193_v7, %v1092_v9  ;;  %v276_v14 = vmul.f32 %v1194_v8, %v1092_v9  ;;  %vm1349_vm14 = vmpackc.low %vm865_vm13, %vm864_vm12  ;;  %vm866_vm15 = vcmp.eq.s32.totalorder %v726_v62, %v1577_v42  ;;  %v661_v5 = vadd.s32 104, %v1575_v41 }
  0x14   : > { %1252 = vmatprep.subr.bf16.mxu0 %v1407_v1  ;;  %v662_v8 = vadd.s32 112, %v1575_v41  ;;  %v663_v9 = vadd.s32 120, %v1575_v41  ;;  %vm531_vm12 = vcmp.eq.s32.totalorder %v1575_v41, 0  ;;  %vm544_vm13 = vcmp.lt.s32.totalorder %v1575_v41, 7 }
  0x15   : > { %v284_v18 = vadd.f32 %v1093_v15, %v275_v13  ;;  %v285_v19 = vadd.f32 %v1093_v15, %v276_v14  ;;  %1271 = vmatpush3.bf16.msra.mxu1 %v1388_v16  ;;  %v761_v7 = vand.u32 7, %v661_v5 }
  0x16   : > { %1272 = vmatprep.subr.bf16.mxu1 %v1407_v1  ;;  %v768_v10 = vand.u32 7, %v662_v8  ;;  %v775_v11 = vand.u32 7, %v663_v9 }
  0x17   : > { %1253 = vmatpush3.bf16.msra.mxu0 %v1379_v12  ;;  %v295_v23 = vmul.f32 %v1094_v20, %v284_v18  ;;  %v296_v24 = vmul.f32 %v1094_v20, %v285_v19  ;;  %vm286_vm1 = vcmp.ge.f32.partialorder %v284_v18, 0.0  ;;  %vm287_vm2 = vcmp.ge.f32.partialorder %v285_v19, 0.0 }
  0x18   : > { %1254 = vmatprep.subr.bf16.mxu0 %v1407_v1  ;;  %vm871_vm6 = vcmp.eq.s32.totalorder %v761_v7, %v1577_v42  ;;  %vm873_vm9 = vcmp.eq.s32.totalorder %v775_v11, %v1577_v42 }
  0x19   : > { %1273 = vmatpush3.bf16.msra.mxu1 %v1390_v21  ;;  %v297_v27 = vsel %vm286_vm1, %v284_v18, %v295_v23  ;;  %v298_v28 = vsel %vm287_vm2, %v285_v19, %v296_v24  ;;  %vm868_vm2 = vcmp.eq.s32.totalorder %v740_v2, %v1577_v42 }
  0x1a   : > { %1274 = vmatprep.subr.bf16.mxu1 %v1407_v1  ;;  %v299_v29 = vpack.c.bf16 %v298_v28, %v297_v27 }
  0x1b   : > { %1255 = vmatpush3.bf16.msra.mxu0 %v1380_v17 }
  0x1c   : > { %1256 = vmatprep.subr.bf16.mxu0 %v1407_v1 }
  0x1d   : > { %1275 = vmatpush3.bf16.msra.mxu1 %v1392_v25 }
  0x1e   : > { %1276 = vmatprep.subr.bf16.mxu1 %v1407_v1 }
  0x1f   : > { %1257 = vmatpush3.bf16.msra.mxu0 %v1381_v22 }
  0x20   : > { %1258 = vmatprep.subr.bf16.mxu0 %v1407_v1 }
  0x21   : > { %1277 = vmatpush3.bf16.msra.mxu1 %v1394_v30 }
  0x22   : > { %1278 = vmatprep.subr.bf16.mxu1 %v1407_v1 }
  0x23   : > { %1259 = vmatpush3.bf16.msra.mxu0 %v1383_v26 }
  0x24   : > { %1284 = vmatprep.subr.bf16.mxu0 %v1407_v1 }
  0x25   : > { %1279 = vmatpush3.bf16.msra.mxu1 %v1396_v32 }
  0x26   : > { %1261 = vmatmul.mubr.bf16.vlgmr.msra.gmra.mrb[0].mxu0 %v299_v29  ;;  %1339 = vmatprep.subr.bf16.mxu1 %v1409_v43 }
  0x27   : > { %1285 = vmatpush3.bf16.msra.mxu0 %v1385_v31  ;;  %1300 = vmatprep.mubr.msk.bf16.mxu0 %vm1408_vm0, %v1407_v1 }
  0x28   : > { %1286 = vmatprep.subr.bf16.mxu0 %v1407_v1  ;;  %1281 = vmatmul.mubr.bf16.vlgmr.msra.gmra.mrb[0].mxu1 %v299_v29 }
  0x29   : > { %1336 = vmatprep.mubr.msk.f32.mxu1 %vm1408_vm0, %v1407_v1  ;;  %1341 = vmatpush3.bf16.msk.msra.mxu1 %vm1340_vm5, %v1410_v47  ;;  %vm867_vm0 = vcmp.eq.s32.totalorder %v733_v63, %v1577_v42  ;;  %vm870_vm5 = vcmp.eq.s32.totalorder %v754_v6, %v1577_v42 }
  0x2a   : > { %1342 = vmatprep.subr.bf16.mxu1 %v1409_v43  ;;  %vm1352_vm1 = vmpackc.low %vm867_vm0, %vm866_vm15  ;;  %vm922_vm15 = vcmask 1040384   ;;  %vm994_vm0 = vcmask 58368  }
  0x2b   : > { %1287 = vmatpush3.bf16.msra.mxu0 %v1387_v33  ;;  %vm1358_vm7 = vmpackc.low %vm871_vm6, %vm870_vm5 }
  0x2c   : > { %1288 = vmatprep.subr.bf16.mxu0 %v1407_v1 }
  0x2d   : > { %1344 = vmatpush3.bf16.msk.msra.mxu1 %vm1343_vm8, %v1410_v47  ;;  %vm872_vm8 = vcmp.eq.s32.totalorder %v768_v10, %v1577_v42 }
  0x2e   : > { %1345 = vmatprep.subr.bf16.mxu1 %v1409_v43  ;;  %vm1361_vm10 = vmpackc.low %vm873_vm9, %vm872_vm8 }
  0x2f   : > { %1289 = vmatpush3.bf16.msra.mxu0 %v1389_v34 }
  0x30   : > { %1290 = vmatprep.subr.bf16.mxu0 %v1407_v1 }
  0x31   : > { %1347 = vmatpush3.bf16.msk.msra.mxu1 %vm1346_vm11, %v1410_v47  ;;  %vm535_vm11 = vcmp.lt.s32.totalorder %v1575_v41, 1 }
  0x32   : > { %1348 = vmatprep.subr.bf16.mxu1 %v1409_v43 }
  0x33   : > { %1291 = vmatpush3.bf16.msra.mxu0 %v1391_v35 }
  0x34   : > { %1292 = vmatprep.subr.bf16.mxu0 %v1407_v1 }
  0x35   : > { %1350 = vmatpush3.bf16.msk.msra.mxu1 %vm1349_vm14, %v1410_v47  ;;  %vm541_vm14 = vcmp.eq.s32.totalorder %v1581_v44, 15 }
  0x36   : > { %1351 = vmatprep.subr.bf16.mxu1 %v1409_v43 }
  0x37   : > { %1293 = vmatpush3.bf16.msra.mxu0 %v1393_v36 }
  0x38   : > { %1294 = vmatprep.subr.bf16.mxu0 %v1407_v1 }
  0x39   : > { %1353 = vmatpush3.bf16.msk.msra.mxu1 %vm1352_vm1, %v1410_v47 }
  0x3a   : > { %1354 = vmatprep.subr.bf16.mxu1 %v1409_v43 }
  0x3b   : > { %1295 = vmatpush3.bf16.msra.mxu0 %v1395_v37 }
  0x3c   : > { %1296 = vmatprep.subr.bf16.mxu0 %v1407_v1 }
  0x3f   : > { %1297 = vmatpush3.bf16.msra.mxu0 %v1397_v38 }
  0x40   : > { %1298 = vmatprep.subr.bf16.mxu0 %v1407_v1  ;;  %v659_v1 = vadd.s32 88, %v1575_v41 }
  0x42   : > { %v747_v3 = vand.u32 7, %v659_v1 }
  0x43   : > { %1299 = vmatpush3.bf16.msra.mxu0 %v1398_v39 }
  0x44   : > { %vm869_vm3 = vcmp.eq.s32.totalorder %v747_v3, %v1577_v42 }
  0x45   : > { %vm1355_vm4 = vmpackc.low %vm869_vm3, %vm868_vm2 }
  0x46   : > { %1301 = vmatmul.mubr.bf16.vlgmr.msra.gmra.mrb[4].mxu0 %v299_v29  ;;  %1356 = vmatpush3.bf16.msk.msra.mxu1 %vm1355_vm4, %v1410_v47 }
  0x47   : > { %1357 = vmatprep.subr.bf16.mxu1 %v1409_v43 }
  0x4a   : > { %1359 = vmatpush3.bf16.msk.msra.mxu1 %vm1358_vm7, %v1410_v47 }
  0x4b   : > { %1360 = vmatprep.subr.bf16.mxu1 %v1409_v43 }
  0x4e   : > { %1362 = vmatpush3.bf16.msk.msra.mxu1 %vm1361_vm10, %v1410_v47 }
  0xf9   : > { %v398_v12 = vpop.f32.mrb[0].mxu0 }
  0xfa   : > { %v533_v13 = vrot.slane %v398_v12, 7  ;;  %v1262_v14 = vpop.f32.mrb[1].mxu0 }
  0xfb   : > { %v401_v15 = vpop.f32.mrb[2].mxu0  ;;  %v521_v21 = vpop.f32.mrb[0].mxu1 }
  0xfc   : > { %v534_v16 = vrot.slane %v401_v15, 7  ;;  %v1263_v17 = vpop.f32.mrb[3].mxu0  ;;  %v542_v22 = vrot.slane %v521_v21, 1  ;;  %v1282_v23 = vpop.f32.mrb[1].mxu1 }
  0xfd   : > { %v524_v24 = vpop.f32.mrb[2].mxu1 }
  0xfe   : > { %v537_v18 = vsel %vm535_vm11, %v534_v16, %v533_v13  ;;  %v536_v19 = vsel %vm535_vm11, %v533_v13, %v534_v16  ;;  %v543_v25 = vrot.slane %v524_v24, 1  ;;  %v1283_v26 = vpop.f32.mrb[3].mxu1 }
  0xff   : > { %v538_v20 = vsel %vm531_vm12, 0.0, %v537_v18 }
 0x100   : > { %v545_v27 = vsel %vm544_vm13, %v542_v22, %v543_v25  ;;  %v546_v28 = vsel %vm544_vm13, %v543_v25, %v542_v22 }
 0x101   : > { %v548_v29 = vsel %vm541_vm14, 0.0, %v546_v28 }
 0x119   : > { %v631_v30 = vpop.f32.mrb[4].mxu0 }
 0x11a   : > { %v632_v31 = vadd.f32 %v631_v30, %v538_v20  ;;  %v1302_v32 = vpop.f32.mrb[5].mxu0 }
 0x11b   : > { %v634_v33 = vpop.f32.mrb[6].mxu0 }
 0x11c   : > { %v638_v34 = vadd.f32 %v632_v31, %v545_v27  ;;  %v635_v35 = vadd.f32 %v634_v33, %v536_v19  ;;  %v1303_v36 = vpop.f32.mrb[7].mxu0 }
 0x11e   : > { %v639_v37 = vadd.f32 %v635_v35, %v548_v29  ;;  %v913_v38 = vmul.f32 %v638_v34, %v638_v34 }
 0x120   : > { %v1198_v39 = vpack.c.bf16 %v639_v37, %v638_v34  ;;  %v906_v40 = vadd.f32 %v639_v37, %v638_v34  ;;  %v914_v41 = vmul.f32 %v639_v37, %v639_v37 }
 0x122   : > { %1199 = vst [vmem:[%s258_s17] sm:$0xff] %v1198_v39   ;;  %v907_v42 = vrot.slane %v906_v40, 4  ;;  %v915_v43 = vadd.f32 %v914_v41, %v913_v38 }
 0x124   : > { %v908_v44 = vadd.f32 %v907_v42, %v906_v40  ;;  %v916_v45 = vrot.slane %v915_v43, 4 }
 0x126   : > { %v909_v46 = vrot.slane %v908_v44, 2  ;;  %v917_v47 = vadd.f32 %v916_v45, %v915_v43 }
 0x128   : > { %v910_v48 = vadd.f32 %v909_v46, %v908_v44  ;;  %v918_v49 = vrot.slane %v917_v47, 2 }
 0x12a   : > { %v911_v50 = vrot.slane %v910_v48, 1  ;;  %v919_v51 = vadd.f32 %v918_v49, %v917_v47 }
 0x12c   : > { %v920_v52 = vrot.slane %v919_v51, 1  ;;  %v912_v53 = vadd.f32 %v911_v50, %v910_v48 }
 0x12e   : > { %v921_v54 = vadd.f32 %v920_v52, %v919_v51 }
 0x130   : > { %v923_v55 = vsel %vm922_vm15, %v912_v53, %v921_v54 }
 0x131   : > { %1337 = vmatmul.mubr.f32.vlgmr.msra.gmra.mrb[4].mxu1 %v923_v55 }
 0x204   : > { %v990_v56 = vpop.f32.mrb[4].mxu1 }
 0x205   : > { %995 = vst.msk [vmem:[%s262_s20] sm:$0x3] %vm994_vm0, %v990_v56  ;;  %v1338_v57 = vpop.f32.mrb[5].mxu1 }
 0x206 PF: > { %s17_s21 = sadd.s32 1, %s1405_s21  }
 0x207   : > { %p14_p4 = scmp.ge.s32.totalorder %s17_s21, 4  }
 0x209   :  { %16 = sbr.rel (!%p14_p4) target bundleno = 1 (0x1), region = 84 }

// kernel: double_conv.5
= control target key start
LH: loop header
LB: loop body
LE: loop exit
PB: predicated region body
PF: predicated region fallthrough
CT: control target
= control target key end

     0   :  { %s351_s15 = smov 0   ;;  %s377_s0 = inlined_call_operand.vmem [shape: bf16[2,16,128], index: 0, kind: input, shape index: {}]   ;;  %s378_s1 = inlined_call_operand.vmem [shape: f32[1,128], index: 1, kind: input, shape index: {}]   ;;  %s379_s2 = inlined_call_operand.vmem [shape: f32[1,128], index: 2, kind: input, shape index: {}]   ;;  %s380_s3 = inlined_call_operand.vmem [shape: f32[1,128], index: 3, kind: input, shape index: {}]   ;;  %s381_s4 = inlined_call_operand.vmem [shape: f32[2,16,128], index: 4, kind: output, shape index: {}]  }
   0x1 LB: > { %s290_s16 = sadd.s32 4294967295, %s324_s15   ;;  %p294_p0 = scmp.ge.s32.totalorder %s324_s15, 1  ;;  %s324_s15 = sphi %s351_s15, %s14_s15  }
   0x2   : > { %p162_p1 = scmp.lt.s32.totalorder %s324_s15, 3 }
   0x4   : > { %p163_p2 = pnand %p294_p0, %p162_p1 }
   0x5   : > { %p188_p3 = scmp.lt.s32.totalorder (!%p163_p2), %s290_s16, 1  ;;  %v299_v1 = vld [vmem:[%s378_s1] ss:$0 sm:$0xff] (!%p163_p2) }
   0x6   : > { %166 = sbr.rel (%p163_p2) target bundleno = 27 (0x1b), region = 36  ;;  %v300_v4 = vld [vmem:[%s379_s2] ss:$0 sm:$0xff] (!%p163_p2) }
   0x7   : > { %v301_v7 = vld [vmem:[%s380_s3] ss:$0 sm:$0xff] (!%p163_p2) }
   0xd   : > { %s383_s16 = smov (!%p188_p3, %s290_s16), 1 }
   0xe   : > { %s304_s17 = sshll.u32 %s383_s16, 3  ;;  %s305_s25 = sshll.u32 %s383_s16, 4 }
   0xf   : > { %s192_s20 = scalar_lea.vmem %s377_s0, %s304_s17  ;;  %s197_s30 = scalar_lea.vmem %s381_s4, %s305_s25 }
  0x10   : > { %v307_v0 = vld [vmem:[%s192_s20] sm:$0xff]  }
  0x11   : > { %v308_v2 = vunpack.c.l.bf16 %v307_v0  ;;  %v309_v3 = vunpack.c.h.bf16 %v307_v0 }
  0x13   : > { %v209_v5 = vmul.f32 %v308_v2, %v299_v1  ;;  %v210_v6 = vmul.f32 %v309_v3, %v299_v1 }
  0x15   : > { %v218_v8 = vadd.f32 %v300_v4, %v209_v5  ;;  %v219_v9 = vadd.f32 %v300_v4, %v210_v6 }
  0x17   : > { %vm220_vm0 = vcmp.ge.f32.partialorder %v218_v8, 0.0  ;;  %v229_v10 = vmul.f32 %v301_v7, %v218_v8  ;;  %vm221_vm1 = vcmp.ge.f32.partialorder %v219_v9, 0.0  ;;  %v230_v11 = vmul.f32 %v301_v7, %v219_v9 }
  0x19   : > { %v231_v12 = vsel %vm220_vm0, %v218_v8, %v229_v10  ;;  %v232_v13 = vsel %vm221_vm1, %v219_v9, %v230_v11 }
  0x1a   : > { %233 = vst [vmem:[%s197_s30] sm:$0xff] %v231_v12  ;;  %234 = vst [vmem:[%s197_s30 + $0x8] sm:$0xff] %v232_v13 }
  0x1b PF: > { %s14_s15 = sadd.s32 1, %s324_s15  }
  0x1c   : > { %p11_p4 = scmp.ge.s32.totalorder %s14_s15, 4  }
  0x1e   :  { %13 = sbr.rel (!%p11_p4) target bundleno = 1 (0x1), region = 66 }

</bundles_post_ra>
